<compile_context>
chip_gen: v7x
topology: tpu7x:2x2x1
jax: 0.10.0
libtpu: 0.0.40
codegen_flags: <defaults>
</compile_context>

<pallas_src>
import jax
import jax.numpy as jnp
from jax.experimental import pallas as pl
from jax.experimental.pallas import tpu as pltpu


# ----------------------------------------------------------------------------
# Kernel
# ----------------------------------------------------------------------------
def _mlp_kernel(x_ref, w1_ref, b1_ref, w2_ref, b2_ref, w3_ref, b3_ref, o_ref):
    """One batch tile: x (TB, IN) f32 -> o (TB, 1) f32.

    Weights are bf16 (VMEM-resident), matmuls accumulate in f32 on the MXU.
    """
    # Layer 1: Linear(input_dim -> hidden_dim) + ReLU.
    # Cast to bf16 right before the dot (x is streamed from HBM as f32).
    x_bf = x_ref[...].astype(jnp.bfloat16)
    h1 = jnp.dot(x_bf, w1_ref[...], preferred_element_type=jnp.float32)
    h1 = jnp.maximum(h1 + b1_ref[...], 0.0)

    # (Dropout -> identity at inference)

    # Layer 2: Linear(hidden_dim -> hidden_dim // 2) + ReLU.
    h2 = jnp.dot(h1.astype(jnp.bfloat16), w2_ref[...],
                 preferred_element_type=jnp.float32)
    h2 = jnp.maximum(h2 + b2_ref[...], 0.0)

    # (Dropout -> identity at inference)

    # Layer 3: Linear(hidden_dim//2 -> 1).  Plain matmul, (TB, 1) result.
    out = jnp.dot(h2.astype(jnp.bfloat16), w3_ref[...],
                  preferred_element_type=jnp.float32)
    o_ref[...] = out + b3_ref[0, 0]


# ----------------------------------------------------------------------------
# Tiling
# ----------------------------------------------------------------------------
def _round_up(n, m):
    return ((n + m - 1) // m) * m


def _pick_tile(batch, desired):
    """Rows per grid step.

    - Big tiles (default 8192 ~= 7 MB working set) amortize the ~0.35 us
      per-grid-step overhead and stay under v5e's 16 MiB default scoped VMEM.
    - Keep >= 2 tiles whenever the batch allows so v7x's two TensorCores
      both get work under dimension_semantics=("parallel",).
    """
    if batch <= 256:
        return batch, 1                       # single full-extent block
    padded = _round_up(batch, 128)
    tb = min(_round_up(desired, 128), padded)
    if pl.cdiv(batch, tb) < 2:
        tb = _round_up(pl.cdiv(padded, 2), 128)
    return tb, pl.cdiv(batch, tb)


# ----------------------------------------------------------------------------
# Wrapper (exactly one Pallas kernel launch per call)
# ----------------------------------------------------------------------------
def simple_neural_classifier(x, prep, *, block_batch=8192):
    """x: (batch, input_dim) f32; prep: output of prepare_params()."""
    batch, in_dim = x.shape
    w1, b1 = prep["w1"], prep["b1"]
    w2, b2 = prep["w2"], prep["b2"]
    w3, b3 = prep["w3"], prep["b3"]

    tb, num_tiles = _pick_tile(batch, block_batch)

    def resident(a):
        # Full-array block with a constant index_map => DMA'd once, stays in
        # VMEM across all batch tiles.
        return pl.BlockSpec(a.shape, lambda i: (0,) * a.ndim)

    out = pl.pallas_call(
        _mlp_kernel,
        out_shape=jax.ShapeDtypeStruct((batch, 1), jnp.float32),
        grid=(num_tiles,),
        in_specs=[
            pl.BlockSpec((tb, in_dim), lambda i: (i, 0)),   # streamed x tiles
            resident(w1), resident(b1),
            resident(w2), resident(b2),
            resident(w3),
            pl.BlockSpec((1, 1), lambda i: (0, 0),
                         memory_space=pltpu.SMEM),          # b3 scalar
        ],
        out_specs=pl.BlockSpec((tb, 1), lambda i: (i, 0)),
        compiler_params=pltpu.CompilerParams(
            dimension_semantics=("parallel",)),  # v7x: 2 TCs split the grid
    )(x, w1, b1, w2, b2, w3, b3)
    return out


# ----------------------------------------------------------------------------
# Parameters
# ----------------------------------------------------------------------------
def init_params(key, input_dim, hidden_dim=64):
    """PyTorch-style init.  nn.Linear stores (out, in); we store (in, out)."""
    h2 = hidden_dim // 2
    ks = jax.random.split(key, 6)

    def lin(kw, kb, fan_in, fan_out):
        bound = 1.0 / jnp.sqrt(fan_in)
        w = jax.random.uniform(kw, (fan_in, fan_out), jnp.float32, -bound, bound)
        b = jax.random.uniform(kb, (fan_out,), jnp.float32, -bound, bound)
        return w, b

    w1, b1 = lin(ks[0], ks[1], input_dim, hidden_dim)
    w2, b2 = lin(ks[2], ks[3], hidden_dim, h2)
    w3, b3 = lin(ks[4], ks[5], h2, 1)
    return {"w1": w1, "b1": b1, "w2": w2, "b2": b2, "w3": w3, "b3": b3}


def prepare_params(params):
    """One-time conversion to kernel layouts (bf16 weights, f32 row biases,
    (1,1) scalar b3).  Done once at load time, not per inference call."""
    return {
        "w1": params["w1"].astype(jnp.bfloat16),
        "b1": params["b1"].reshape(1, -1).astype(jnp.float32),
        "w2": params["w2"].astype(jnp.bfloat16),
        "b2": params["b2"].reshape(1, -1).astype(jnp.float32),
        "w3": params["w3"].astype(jnp.bfloat16),
        "b3": params["b3"].reshape(1, 1).astype(jnp.float32),
    }


def _reference(x, prep):
    """Pure-JAX reference mirroring the kernel's bf16-in / f32-accumulate math."""
    h1 = jnp.maximum(
        jnp.dot(x.astype(jnp.bfloat16), prep["w1"],
                preferred_element_type=jnp.float32) + prep["b1"], 0.0)
    h2 = jnp.maximum(
        jnp.dot(h1.astype(jnp.bfloat16), prep["w2"],
                preferred_element_type=jnp.float32) + prep["b2"], 0.0)
    return jnp.dot(h2.astype(jnp.bfloat16), prep["w3"],
                   preferred_element_type=jnp.float32) + prep["b3"]


if __name__ == "__main__":
    key = jax.random.PRNGKey(0)
    k_x, k_p = jax.random.split(key)

    # Small but multi-tile + ragged edge: batch=1000 -> 2 tiles of 512 rows,
    # last tile clipped (rows 1000..1023 never written back).
    batch, input_dim, hidden_dim = 1000, 32, 64
    x = jax.random.normal(k_x, (batch, input_dim), jnp.float32)
    raw_params = init_params(k_p, input_dim, hidden_dim)
    prep = prepare_params(raw_params)   # one-time prep, outside the call

    out = jax.block_until_ready(simple_neural_classifier(x, prep))
    ref = _reference(x, prep)

    assert out.shape == (batch, 1), out.shape
    assert jnp.allclose(out, ref, atol=2e-2, rtol=2e-2), "mismatch vs reference"

    print("KERNEL_OK")
</pallas_src>

<mosaic_0001>
module attributes {stable_mosaic.version = 11 : i64} {
  func.func @_mlp_kernel(%arg0: i32, %arg1: memref<512x32xf32, #tpu.memory_space<vmem>>, %arg2: memref<32x64xbf16, #tpu.memory_space<vmem>>, %arg3: memref<1x64xf32, #tpu.memory_space<vmem>>, %arg4: memref<64x32xbf16, #tpu.memory_space<vmem>>, %arg5: memref<1x32xf32, #tpu.memory_space<vmem>>, %arg6: memref<32x1xbf16, #tpu.memory_space<vmem>>, %arg7: memref<1x1xf32, #tpu.memory_space<smem>>, %arg8: memref<512x1xf32, #tpu.memory_space<vmem>>) attributes {dimension_semantics = [#tpu.dimension_semantics<parallel>], iteration_bounds = array<i64: 2>, scalar_prefetch = 0 : i64, scratch_operands = 0 : i64, tpu.core_type = #tpu.core_type<tc>, window_params = [{transform_indices = @transform_0, window_bounds = array<i64: 512, 32>}, {pipeline_mode = #tpu.pipeline_mode<synchronous>, transform_indices = @transform_1, window_bounds = array<i64: 32, 64>}, {pipeline_mode = #tpu.pipeline_mode<synchronous>, transform_indices = @transform_2, window_bounds = array<i64: 1, 64>}, {pipeline_mode = #tpu.pipeline_mode<synchronous>, transform_indices = @transform_3, window_bounds = array<i64: 64, 32>}, {pipeline_mode = #tpu.pipeline_mode<synchronous>, transform_indices = @transform_4, window_bounds = array<i64: 1, 32>}, {pipeline_mode = #tpu.pipeline_mode<synchronous>, transform_indices = @transform_5, window_bounds = array<i64: 32, 1>}, {transform_indices = @transform_6, window_bounds = array<i64: 1, 1>}, {transform_indices = @transform_7, window_bounds = array<i64: 512, 1>}]} {
    %c0 = arith.constant 0 : index
    %c0_0 = arith.constant 0 : index
    %0 = vector.load %arg1[%c0, %c0_0] : memref<512x32xf32, #tpu.memory_space<vmem>>, vector<512x32xf32>
    %1 = arith.truncf %0 : vector<512x32xf32> to vector<512x32xbf16>
    %c0_1 = arith.constant 0 : index
    %c0_2 = arith.constant 0 : index
    %2 = vector.load %arg2[%c0_1, %c0_2] : memref<32x64xbf16, #tpu.memory_space<vmem>>, vector<32x64xbf16>
    %cst = arith.constant dense<0.000000e+00> : vector<512x64xf32>
    %3 = tpu.matmul %1, %2, %cst {dimension_numbers = #tpu.dot_dimension_numbers<[1], [0], [0], [1], [0, 0, 1, 1], [], []>} : vector<512x32xbf16>, vector<32x64xbf16>, vector<512x64xf32> -> vector<512x64xf32>
    %c0_3 = arith.constant 0 : index
    %c0_4 = arith.constant 0 : index
    %4 = vector.load %arg3[%c0_3, %c0_4] : memref<1x64xf32, #tpu.memory_space<vmem>>, vector<1x64xf32>
    %5 = vector.broadcast %4 : vector<1x64xf32> to vector<512x64xf32>
    %6 = arith.addf %3, %5 : vector<512x64xf32>
    %cst_5 = arith.constant 0.000000e+00 : f32
    %7 = vector.broadcast %cst_5 : f32 to vector<512x64xf32>
    %8 = arith.maximumf %6, %7 : vector<512x64xf32>
    %9 = arith.truncf %8 : vector<512x64xf32> to vector<512x64xbf16>
    %c0_6 = arith.constant 0 : index
    %c0_7 = arith.constant 0 : index
    %10 = vector.load %arg4[%c0_6, %c0_7] : memref<64x32xbf16, #tpu.memory_space<vmem>>, vector<64x32xbf16>
    %cst_8 = arith.constant dense<0.000000e+00> : vector<512x32xf32>
    %11 = tpu.matmul %9, %10, %cst_8 {dimension_numbers = #tpu.dot_dimension_numbers<[1], [0], [0], [1], [0, 0, 1, 1], [], []>} : vector<512x64xbf16>, vector<64x32xbf16>, vector<512x32xf32> -> vector<512x32xf32>
    %c0_9 = arith.constant 0 : index
    %c0_10 = arith.constant 0 : index
    %12 = vector.load %arg5[%c0_9, %c0_10] : memref<1x32xf32, #tpu.memory_space<vmem>>, vector<1x32xf32>
    %13 = vector.broadcast %12 : vector<1x32xf32> to vector<512x32xf32>
    %14 = arith.addf %11, %13 : vector<512x32xf32>
    %cst_11 = arith.constant 0.000000e+00 : f32
    %15 = vector.broadcast %cst_11 : f32 to vector<512x32xf32>
    %16 = arith.maximumf %14, %15 : vector<512x32xf32>
    %17 = arith.truncf %16 : vector<512x32xf32> to vector<512x32xbf16>
    %c0_12 = arith.constant 0 : index
    %c0_13 = arith.constant 0 : index
    %18 = vector.load %arg6[%c0_12, %c0_13] : memref<32x1xbf16, #tpu.memory_space<vmem>>, vector<32x1xbf16>
    %cst_14 = arith.constant dense<0.000000e+00> : vector<512x1xf32>
    %19 = tpu.matmul %17, %18, %cst_14 {dimension_numbers = #tpu.dot_dimension_numbers<[1], [0], [0], [1], [0, 0, 1, 1], [], []>} : vector<512x32xbf16>, vector<32x1xbf16>, vector<512x1xf32> -> vector<512x1xf32>
    %c0_15 = arith.constant 0 : index
    %c0_16 = arith.constant 0 : index
    %20 = memref.load %arg7[%c0_15, %c0_16] : memref<1x1xf32, #tpu.memory_space<smem>>
    %21 = vector.broadcast %20 : f32 to vector<512x1xf32>
    %22 = arith.addf %19, %21 : vector<512x1xf32>
    %c0_17 = arith.constant 0 : index
    %c0_18 = arith.constant 0 : index
    %23 = vector.load %arg8[%c0_17, %c0_18] : memref<512x1xf32, #tpu.memory_space<vmem>>, vector<512x1xf32>
    tpu.vector_store %arg8[%c0_17, %c0_18], %22 {strides = array<i32>} : memref<512x1xf32, #tpu.memory_space<vmem>>, vector<512x1xf32>,
    return
  }
  func.func @transform_0(%arg0: i32) -> (i32, i32) {
    %c0_i32 = arith.constant 0 : i32
    %c0_i32_0 = arith.constant 0 : i32
    return %arg0, %c0_i32 : i32, i32
  }
  func.func @transform_1(%arg0: i32) -> (i32, i32) {
    %c0_i32 = arith.constant 0 : i32
    %c0_i32_0 = arith.constant 0 : i32
    %c0_i32_1 = arith.constant 0 : i32
    return %c0_i32, %c0_i32_0 : i32, i32
  }
  func.func @transform_2(%arg0: i32) -> (i32, i32) {
    %c0_i32 = arith.constant 0 : i32
    %c0_i32_0 = arith.constant 0 : i32
    %c0_i32_1 = arith.constant 0 : i32
    return %c0_i32, %c0_i32_0 : i32, i32
  }
  func.func @transform_3(%arg0: i32) -> (i32, i32) {
    %c0_i32 = arith.constant 0 : i32
    %c0_i32_0 = arith.constant 0 : i32
    %c0_i32_1 = arith.constant 0 : i32
    return %c0_i32, %c0_i32_0 : i32, i32
  }
  func.func @transform_4(%arg0: i32) -> (i32, i32) {
    %c0_i32 = arith.constant 0 : i32
    %c0_i32_0 = arith.constant 0 : i32
    %c0_i32_1 = arith.constant 0 : i32
    return %c0_i32, %c0_i32_0 : i32, i32
  }
  func.func @transform_5(%arg0: i32) -> (i32, i32) {
    %c0_i32 = arith.constant 0 : i32
    %c0_i32_0 = arith.constant 0 : i32
    %c0_i32_1 = arith.constant 0 : i32
    return %c0_i32, %c0_i32_0 : i32, i32
  }
  func.func @transform_6(%arg0: i32) -> (i32, i32) {
    %c0_i32 = arith.constant 0 : i32
    %c0_i32_0 = arith.constant 0 : i32
    %c0_i32_1 = arith.constant 0 : i32
    return %c0_i32, %c0_i32_0 : i32, i32
  }
  func.func @transform_7(%arg0: i32) -> (i32, i32) {
    %c0_i32 = arith.constant 0 : i32
    %c0_i32_0 = arith.constant 0 : i32
    return %arg0, %c0_i32 : i32, i32
  }
}

</mosaic_0001>

<bundles_post_ra>
// kernel: tpu_custom_call.1
= control target key start
LH: loop header
LB: loop body
LE: loop exit
PB: predicated region body
PF: predicated region fallthrough
CT: control target
= control target key end

     0   :  { %s3829_s0 = inlined_call_operand.vmem [shape: f32[1000,32], index: 0, kind: input, shape index: {}]   ;;  %s3830_s1 = inlined_call_operand.vmem [shape: bf16[32,64], index: 1, kind: input, shape index: {}]   ;;  %s3831_s2 = inlined_call_operand.vmem [shape: f32[1,64], index: 2, kind: input, shape index: {}]   ;;  %s3832_s3 = inlined_call_operand.vmem [shape: bf16[64,32], index: 3, kind: input, shape index: {}]   ;;  %s3833_s4 = inlined_call_operand.vmem [shape: f32[1,32], index: 4, kind: input, shape index: {}]   ;;  %s3834_s5 = inlined_call_operand.vmem [shape: bf16[32,1], index: 5, kind: input, shape index: {}]   ;;  %s3835_s6 = inlined_call_operand.<no memory space> [shape: f32[1,1], index: 6, kind: input, shape index: {}]   ;;  %s3836_s7 = inlined_call_operand.vmem [shape: f32[1000,1], index: 7, kind: output, shape index: {}]  }
   0x1   :  { %12 = sst [smem:[#allocation2]] %s3835_s6 }
   0x2   :  { %s3035_s26 = smov 0   ;;  %s3037_s27 = smov 0  }
   0x3   :  { %s3039_s28 = smov 0  }
   0x4 LB: > { %s3048_s6 = sadd.s32 4294967295, %s2958_s28   ;;  %s3050_s29 = sadd.s32 1, %s2958_s28   ;;  %s2958_s28 = sphi %s3039_s28, %s3845_s28   ;;  %s2954_s27 = sphi %s3037_s27, %s3844_s27   ;;  %s2950_s26 = sphi %s3035_s26, %s3843_s26  }
   0x5   : > { %s174_s30 = ssub.s32 %s2958_s28, %s3050_s29  ;;  %s177_s8 = sadd.s32 1, %s2954_s27 }
   0x6   : > { %p175_p0 = scmp.eq.s32.totalorder %s174_s30, 0  ;;  %p187_p1 = scmp.ne.s32.totalorder %s2954_s27, %s2950_s26 }
   0x7   : > { %p188_p2 = scmp.eq.s32.totalorder %s3048_s6, 1  ;;  %p2362_p3 = scmp.ge.s32.totalorder %s2958_s28, 1 }
   0x8   : > { %s3058_s9 = scalar_select %p175_p0, %s2954_s27, %s177_s8  }
   0x9   : > { %p3060_p4 = por %p188_p2, %p187_p1  ;;  %p247_p5 = scmp.lt.s32.totalorder %s2958_s28, 3 }
   0xb   : > { %p248_p6 = pnand %p2362_p3, %p247_p5 }
   0xc   : > { %v2896_v0 = vld [vmem:[%s3830_s1] sm:$0xff] (!%p248_p6)   ;;  %s3068_s13 = sshll.u32 (!%p248_p6), %s3048_s6, 6  ;;  %v2897_v1 = vld [vmem:[%s3830_s1 + $0x8] sm:$0xff] (!%p248_p6)   ;;  %vm421_vm0 = vcmask (!%p248_p6), 261120   ;;  %v2900_v38 = vld [vmem:[%s3832_s3 + $0x10] sm:$0xff] (!%p248_p6)   ;;  %vm942_vm1 = vcmask (!%p248_p6), 523264  }
   0xd   : > { %251 = sbr.rel (%p248_p6) target bundleno = 882 (0x372), region = 48  ;;  %p287_p7 = scmp.lt.s32.totalorder (!%p248_p6), %s3068_s13, 124  ;;  %2596 = vmatprep.subr.bf16.mxu0 (!%p248_p6), %v2896_v0  ;;  %2804 = vmatprep.subr.bf16.mxu1 (!%p248_p6), %v2896_v0  ;;  %v2898_v2 = vld [vmem:[%s3832_s3] sm:$0xff] (!%p248_p6)   ;;  %v2899_v29 = vld [vmem:[%s3832_s3 + $0x8] sm:$0xff] (!%p248_p6)   ;;  %v2901_v41 = vld [vmem:[%s3832_s3 + $0x18] sm:$0xff] (!%p248_p6)   ;;  %vm1827_vm2 = vcmask (!%p248_p6), 7168  }
   0xe   : > { %2597 = vmatpush3.bf16.msra.mxu0 (!%p248_p6), %v2896_v0  ;;  %2806 = vmatpush3.bf16.msra.mxu1 (!%p248_p6), %v2896_v0  ;;  %s1428_s20 = sld [smem:[#allocation2]] (!%p248_p6)  ;;  %s279_s21 = sand.u32 (!%p248_p6), 1, %s2950_s26  }
   0xf   : > { %2598 = vmatprep.subr.bf16.mxu0 (!%p248_p6), %v2897_v1  ;;  %2805 = vmatprep.subr.bf16.mxu1 (!%p248_p6), %v2897_v1 }
  0x12   : > { %2599 = vmatpush3.bf16.msra.mxu0 (!%p248_p6), %v2897_v1  ;;  %2807 = vmatpush3.bf16.msra.mxu1 (!%p248_p6), %v2897_v1 }
  0x13   : > { %2664 = vmatprep.subr.bf16.mxu1 (!%p248_p6), %v2898_v2 }
  0x14   : > { %s288_s16 = scalar_select %p287_p7, %s3068_s13, 124 }
  0x15   : > { %s1900_s26 = ssub.s32 (%p3060_p4), 125, %s3068_s13  ;;  %s2489_s24 = sshll.u32 (%p3060_p4), %s3048_s6, 9 }
  0x16   : > { %s2365_s19 = sshll.u32 %s288_s16, 3  ;;  %p1901_p8 = scmp.lt.s32.totalorder (%p3060_p4), %s1900_s26, 64 }
  0x17   : > { %s3081_s22 = scalar_lea.vmem %s3829_s0, %s2365_s19  ;;  %s3630_s30 = scalar_lea.vmem (%p3060_p4), %s3836_s7, %s2489_s24  }
  0x18   : > { %v302_v3 = vld [vmem:[%s3081_s22] sm:$0xff]  ;;  %v303_v4 = vld [vmem:[%s3081_s22 + $0x8] sm:$0xff]  ;;  %v304_v5 = vld [vmem:[%s3081_s22 + $0x10] sm:$0xff] }
  0x19   : > { %v366_v6 = vpack.c.bf16 %v303_v4, %v302_v3  ;;  %v305_v7 = vld [vmem:[%s3081_s22 + $0x18] sm:$0xff]  ;;  %v306_v8 = vld [vmem:[%s3081_s22 + $0x20] sm:$0xff]  ;;  %v307_v9 = vld [vmem:[%s3081_s22 + $0x28] sm:$0xff] }
  0x1a   : > { %v367_v10 = vpack.c.bf16 %v305_v7, %v304_v5  ;;  %v368_v11 = vpack.c.bf16 %v307_v9, %v306_v8  ;;  %v308_v12 = vld [vmem:[%s3081_s22 + $0x30] sm:$0xff]  ;;  %v309_v13 = vld [vmem:[%s3081_s22 + $0x38] sm:$0xff]  ;;  %v310_v14 = vld [vmem:[%s3081_s22 + $0x40] sm:$0xff] }
  0x1b   : > { %2600 = vmatprep.mubr.msk.bf16.mxu0 %vm421_vm0, %v366_v6  ;;  %v311_v15 = vld [vmem:[%s3081_s22 + $0x48] sm:$0xff]  ;;  %v369_v16 = vpack.c.bf16 %v309_v13, %v308_v12  ;;  %v334_v18 = vld [vmem:[%s3081_s22 + $0x100] sm:$0xff]  ;;  %v336_v20 = vld [vmem:[%s3081_s22 + $0x110] sm:$0xff] }
  0x1c   : > { %2601 = vmatmul.mubr.msk.bf16.vlgmr.msra.gmra.mrb[0].mxu0 %vm421_vm0, %v367_v10  ;;  %v370_v17 = vpack.c.bf16 %v311_v15, %v310_v14  ;;  %v335_v19 = vld [vmem:[%s3081_s22 + $0x108] sm:$0xff]  ;;  %v337_v21 = vld [vmem:[%s3081_s22 + $0x118] sm:$0xff]  ;;  %v338_v24 = vld [vmem:[%s3081_s22 + $0x120] sm:$0xff] }
  0x1d   : > { %2604 = vmatprep.mubr.msk.bf16.mxu0 %vm421_vm0, %v368_v11  ;;  %v382_v22 = vpack.c.bf16 %v335_v19, %v334_v18  ;;  %v383_v23 = vpack.c.bf16 %v337_v21, %v336_v20  ;;  %v339_v25 = vld [vmem:[%s3081_s22 + $0x128] sm:$0xff]  ;;  %v312_v26 = vld [vmem:[%s3081_s22 + $0x50] sm:$0xff]  ;;  %v313_v27 = vld [vmem:[%s3081_s22 + $0x58] sm:$0xff] }
  0x1e   : > { %v384_v28 = vpack.c.bf16 %v339_v25, %v338_v24  ;;  %v314_v30 = vld [vmem:[%s3081_s22 + $0x60] sm:$0xff]  ;;  %v315_v31 = vld [vmem:[%s3081_s22 + $0x68] sm:$0xff]  ;;  %v371_v32 = vpack.c.bf16 %v313_v27, %v312_v26  ;;  %v340_v33 = vld [vmem:[%s3081_s22 + $0x130] sm:$0xff] }
  0x1f   : > { %2632 = vmatprep.mubr.msk.bf16.mxu1 %vm421_vm0, %v382_v22  ;;  %v341_v34 = vld [vmem:[%s3081_s22 + $0x138] sm:$0xff]  ;;  %v372_v35 = vpack.c.bf16 %v315_v31, %v314_v30  ;;  %v342_v36 = vld [vmem:[%s3081_s22 + $0x140] sm:$0xff]  ;;  %v343_v37 = vld [vmem:[%s3081_s22 + $0x148] sm:$0xff] }
  0x20   : > { %2633 = vmatmul.mubr.msk.bf16.vlgmr.msra.gmra.mrb[0].mxu1 %vm421_vm0, %v383_v23  ;;  %v385_v39 = vpack.c.bf16 %v341_v34, %v340_v33  ;;  %v386_v40 = vpack.c.bf16 %v343_v37, %v342_v36  ;;  %v316_v42 = vld [vmem:[%s3081_s22 + $0x70] sm:$0xff]  ;;  %v317_v43 = vld [vmem:[%s3081_s22 + $0x78] sm:$0xff]  ;;  %v318_v44 = vld [vmem:[%s3081_s22 + $0x80] sm:$0xff] }
  0x21   : > { %2636 = vmatprep.mubr.msk.bf16.mxu1 %vm421_vm0, %v384_v28  ;;  %2665 = vmatpush3.bf16.msra.mxu1 %v2898_v2  ;;  %v319_v45 = vld [vmem:[%s3081_s22 + $0x88] sm:$0xff]  ;;  %v373_v46 = vpack.c.bf16 %v317_v43, %v316_v42  ;;  %v344_v47 = vld [vmem:[%s3081_s22 + $0x150] sm:$0xff]  ;;  %v345_v48 = vld [vmem:[%s3081_s22 + $0x158] sm:$0xff] }
  0x22   : > { %2666 = vmatprep.subr.bf16.mxu1 %v2899_v29  ;;  %v374_v49 = vpack.c.bf16 %v319_v45, %v318_v44  ;;  %v346_v50 = vld [vmem:[%s3081_s22 + $0x160] sm:$0xff]  ;;  %v347_v51 = vld [vmem:[%s3081_s22 + $0x168] sm:$0xff]  ;;  %v387_v52 = vpack.c.bf16 %v345_v48, %v344_v47  ;;  %v320_v54 = vld [vmem:[%s3081_s22 + $0x90] sm:$0xff] }
  0x23   : > { %v388_v53 = vpack.c.bf16 %v347_v51, %v346_v50  ;;  %v321_v55 = vld [vmem:[%s3081_s22 + $0x98] sm:$0xff]  ;;  %v322_v56 = vld [vmem:[%s3081_s22 + $0xa0] sm:$0xff]  ;;  %v323_v57 = vld [vmem:[%s3081_s22 + $0xa8] sm:$0xff] }
  0x24   : > { %2605 = vmatmul.mubr.msk.bf16.gmra.mrb[4].mxu0 %vm421_vm0, %v369_v16  ;;  %v375_v58 = vpack.c.bf16 %v321_v55, %v320_v54  ;;  %v348_v59 = vld [vmem:[%s3081_s22 + $0x170] sm:$0xff]  ;;  %v349_v60 = vld [vmem:[%s3081_s22 + $0x178] sm:$0xff]  ;;  %v376_v61 = vpack.c.bf16 %v323_v57, %v322_v56  ;;  %v350_v62 = vld [vmem:[%s3081_s22 + $0x180] sm:$0xff] }
  0x25   : > { %2608 = vmatprep.mubr.msk.bf16.mxu0 %vm421_vm0, %v370_v17  ;;  %2667 = vmatpush3.bf16.msra.mxu1 %v2899_v29  ;;  %v351_v63 = vld [vmem:[%s3081_s22 + $0x188] sm:$0xff]  ;;  %v389_v0 = vpack.c.bf16 %v349_v60, %v348_v59  ;;  %v324_v2 = vld [vmem:[%s3081_s22 + $0xb0] sm:$0xff]  ;;  %v325_v3 = vld [vmem:[%s3081_s22 + $0xb8] sm:$0xff] }
  0x26   : > { %2668 = vmatprep.subr.bf16.mxu1 %v2900_v38  ;;  %v390_v1 = vpack.c.bf16 %v351_v63, %v350_v62  ;;  %v326_v4 = vld [vmem:[%s3081_s22 + $0xc0] sm:$0xff]  ;;  %v327_v5 = vld [vmem:[%s3081_s22 + $0xc8] sm:$0xff]  ;;  %v377_v6 = vpack.c.bf16 %v325_v3, %v324_v2  ;;  %v352_v7 = vld [vmem:[%s3081_s22 + $0x190] sm:$0xff] }
  0x27   : > { %v353_v8 = vld [vmem:[%s3081_s22 + $0x198] sm:$0xff]  ;;  %v378_v9 = vpack.c.bf16 %v327_v5, %v326_v4  ;;  %v354_v10 = vld [vmem:[%s3081_s22 + $0x1a0] sm:$0xff]  ;;  %v355_v11 = vld [vmem:[%s3081_s22 + $0x1a8] sm:$0xff] }
  0x28   : > { %2637 = vmatmul.mubr.msk.bf16.gmra.mrb[4].mxu1 %vm421_vm0, %v385_v39  ;;  %v391_v12 = vpack.c.bf16 %v353_v8, %v352_v7  ;;  %v392_v13 = vpack.c.bf16 %v355_v11, %v354_v10  ;;  %v328_v14 = vld [vmem:[%s3081_s22 + $0xd0] sm:$0xff]  ;;  %v329_v15 = vld [vmem:[%s3081_s22 + $0xd8] sm:$0xff]  ;;  %v330_v16 = vld [vmem:[%s3081_s22 + $0xe0] sm:$0xff] }
  0x29   : > { %2640 = vmatprep.mubr.msk.bf16.mxu1 %vm421_vm0, %v386_v40  ;;  %2669 = vmatpush3.bf16.msra.mxu1 %v2900_v38  ;;  %v331_v17 = vld [vmem:[%s3081_s22 + $0xe8] sm:$0xff]  ;;  %v379_v18 = vpack.c.bf16 %v329_v15, %v328_v14  ;;  %v356_v19 = vld [vmem:[%s3081_s22 + $0x1b0] sm:$0xff]  ;;  %v357_v20 = vld [vmem:[%s3081_s22 + $0x1b8] sm:$0xff] }
  0x2a   : > { %2670 = vmatprep.subr.bf16.mxu1 %v2901_v41  ;;  %v380_v21 = vpack.c.bf16 %v331_v17, %v330_v16  ;;  %v358_v22 = vld [vmem:[%s3081_s22 + $0x1c0] sm:$0xff]  ;;  %v359_v23 = vld [vmem:[%s3081_s22 + $0x1c8] sm:$0xff]  ;;  %v393_v24 = vpack.c.bf16 %v357_v20, %v356_v19  ;;  %v332_v26 = vld [vmem:[%s3081_s22 + $0xf0] sm:$0xff] }
  0x2b   : > { %v394_v25 = vpack.c.bf16 %v359_v23, %v358_v22  ;;  %v333_v27 = vld [vmem:[%s3081_s22 + $0xf8] sm:$0xff]  ;;  %v360_v29 = vld [vmem:[%s3081_s22 + $0x1d0] sm:$0xff]  ;;  %v362_v31 = vld [vmem:[%s3081_s22 + $0x1e0] sm:$0xff] }
  0x2c   : > { %2609 = vmatmul.mubr.msk.bf16.gmra.mrb[8].mxu0 %vm421_vm0, %v371_v32  ;;  %v381_v28 = vpack.c.bf16 %v333_v27, %v332_v26  ;;  %v361_v30 = vld [vmem:[%s3081_s22 + $0x1d8] sm:$0xff]  ;;  %v363_v32 = vld [vmem:[%s3081_s22 + $0x1e8] sm:$0xff]  ;;  %v3191_v38 = vld [vmem:[%s3831_s2] ss:$0 sm:$0xff] }
  0x2d   : > { %2612 = vmatprep.mubr.msk.bf16.mxu0 %vm421_vm0, %v372_v35  ;;  %2671 = vmatpush3.bf16.msra.mxu1 %v2901_v41  ;;  %v395_v33 = vpack.c.bf16 %v361_v30, %v360_v29  ;;  %v396_v34 = vpack.c.bf16 %v363_v32, %v362_v31  ;;  %v364_v35 = vld [vmem:[%s3081_s22 + $0x1f0] sm:$0xff]  ;;  %v365_v36 = vld [vmem:[%s3081_s22 + $0x1f8] sm:$0xff]  ;;  %v2903_v47 = vld [vmem:[%s3834_s5 + $0x8] sm:$0xff]   ;;  %s2363_s22 = sshll.u32 %s279_s21, 9 }
  0x2e   : > { %v397_v37 = vpack.c.bf16 %v365_v36, %v364_v35  ;;  %s3431_s23 = scalar_lea.vmem [#allocation3], %s2363_s22  }
  0x30   : > { %2641 = vmatmul.mubr.msk.bf16.gmra.mrb[8].mxu1 %vm421_vm0, %v387_v52 }
  0x31   : > { %2644 = vmatprep.mubr.msk.bf16.mxu1 %vm421_vm0, %v388_v53 }
  0x34   : > { %2613 = vmatmul.mubr.msk.bf16.gmra.mrb[12].mxu0 %vm421_vm0, %v373_v46  ;;  %v2902_v46 = vld [vmem:[%s3834_s5] sm:$0xff]  }
  0x35   : > { %2616 = vmatprep.mubr.msk.bf16.mxu0 %vm421_vm0, %v374_v49  ;;  %2736 = vmatprep.subr.bf16.mxu0 %v2902_v46 }
  0x36   : > { %2737 = vmatpush3.bf16.msra.mxu0 %v2902_v46 }
  0x37   : > { %2738 = vmatprep.subr.bf16.mxu0 %v2903_v47 }
  0x38   : > { %2645 = vmatmul.mubr.msk.bf16.gmra.mrb[12].mxu1 %vm421_vm0, %v389_v0 }
  0x39   : > { %2648 = vmatprep.mubr.msk.bf16.mxu1 %vm421_vm0, %v390_v1 }
  0x3a   : > { %2739 = vmatpush3.bf16.msra.mxu0 %v2903_v47 }
  0x3c   : > { %2617 = vmatmul.mubr.msk.bf16.gmra.mrb[16].mxu0 %vm421_vm0, %v375_v58 }
  0x3d   : > { %2620 = vmatprep.mubr.msk.bf16.mxu0 %vm421_vm0, %v376_v61 }
  0x40   : > { %2649 = vmatmul.mubr.msk.bf16.gmra.mrb[16].mxu1 %vm421_vm0, %v391_v12 }
  0x41   : > { %2652 = vmatprep.mubr.msk.bf16.mxu1 %vm421_vm0, %v392_v13 }
  0x44   : > { %2621 = vmatmul.mubr.msk.bf16.gmra.mrb[20].mxu0 %vm421_vm0, %v377_v6 }
  0x45   : > { %2624 = vmatprep.mubr.msk.bf16.mxu0 %vm421_vm0, %v378_v9 }
  0x48   : > { %2653 = vmatmul.mubr.msk.bf16.gmra.mrb[20].mxu1 %vm421_vm0, %v393_v24 }
  0x49   : > { %2656 = vmatprep.mubr.msk.bf16.mxu1 %vm421_vm0, %v394_v25 }
  0x4c   : > { %2625 = vmatmul.mubr.msk.bf16.gmra.mrb[24].mxu0 %vm421_vm0, %v379_v18 }
  0x4d   : > { %2628 = vmatprep.mubr.msk.bf16.mxu0 %vm421_vm0, %v380_v21 }
  0x50   : > { %2657 = vmatmul.mubr.msk.bf16.gmra.mrb[24].mxu1 %vm421_vm0, %v395_v33 }
  0x51   : > { %2660 = vmatprep.mubr.msk.bf16.mxu1 %vm421_vm0, %v396_v34 }
  0x54   : > { %2629 = vmatmul.mubr.msk.bf16.gmra.mrb[28].mxu0 %vm421_vm0, %v381_v28 }
  0x58   : > { %2661 = vmatmul.mubr.msk.bf16.gmra.mrb[28].mxu1 %vm421_vm0, %v397_v37 }
  0xef   : > { %v2602_v39 = vpop.f32.mrb[0].mxu0 }
  0xf0   : > { %v561_v40 = vadd.f32 %v2602_v39, %v3191_v38  ;;  %v552_v41 = vpop.f32.mrb[1].mxu0 }
  0xf1   : > { %v553_v42 = vadd.f32 %v3191_v38, %v552_v41  ;;  %v2603_v43 = vpop.f32.mrb[2].mxu0 }
  0xf2   : > { %v564_v44 = vadd.f32 %v2603_v43, %v3191_v38  ;;  %v555_v45 = vpop.f32.mrb[3].mxu0  ;;  %v809_v49 = vmax.f32 %v561_v40, 0.0 }
  0xf3   : > { %v556_v48 = vadd.f32 %v3191_v38, %v555_v45  ;;  %v807_v51 = vmax.f32 %v553_v42, 0.0  ;;  %v2634_v62 = vpop.f32.mrb[0].mxu1 }
  0xf4   : > { %v810_v50 = vmax.f32 %v564_v44, 0.0  ;;  %v689_v0 = vadd.f32 %v2634_v62, %v3191_v38  ;;  %v680_v1 = vpop.f32.mrb[1].mxu1 }
  0xf5   : > { %v808_v52 = vmax.f32 %v556_v48, 0.0  ;;  %v681_v4 = vadd.f32 %v3191_v38, %v680_v1  ;;  %v2635_v5 = vpop.f32.mrb[2].mxu1 }
  0xf6   : > { %v872_v53 = vpack.c.bf16 %v810_v50, %v809_v49  ;;  %v841_v8 = vmax.f32 %v689_v0, 0.0  ;;  %v692_v9 = vadd.f32 %v2635_v5, %v3191_v38  ;;  %v683_v10 = vpop.f32.mrb[3].mxu1 }
  0xf7   : > { %v871_v54 = vpack.c.bf16 %v808_v52, %v807_v51  ;;  %v2606_v55 = vpop.f32.mrb[4].mxu0  ;;  %v839_v12 = vmax.f32 %v681_v4, 0.0  ;;  %v684_v13 = vadd.f32 %v3191_v38, %v683_v10 }
  0xf8   : > { %v577_v56 = vadd.f32 %v2606_v55, %v3191_v38  ;;  %v568_v57 = vpop.f32.mrb[5].mxu0  ;;  %v842_v16 = vmax.f32 %v692_v9, 0.0 }
  0xf9   : > { %v569_v58 = vadd.f32 %v3191_v38, %v568_v57  ;;  %v2607_v59 = vpop.f32.mrb[6].mxu0  ;;  %2672 = vmatprep.mubr.msk.bf16.mxu1 %vm942_vm1, %v871_v54  ;;  %v840_v19 = vmax.f32 %v684_v13, 0.0 }
  0xfa   : > { %v580_v60 = vadd.f32 %v2607_v59, %v3191_v38  ;;  %v571_v61 = vpop.f32.mrb[7].mxu0  ;;  %2673 = vmatmul.mubr.msk.bf16.vlgmr.msra.gmra.mrb[32].mxu1 %vm942_vm1, %v872_v53  ;;  %v813_v2 = vmax.f32 %v577_v56, 0.0  ;;  %v3216_v22 = vpack.c.bf16 %v842_v16, %v841_v8 }
  0xfb   : > { %v572_v63 = vadd.f32 %v3191_v38, %v571_v61  ;;  %v811_v6 = vmax.f32 %v569_v58, 0.0  ;;  %v3220_v25 = vpack.c.bf16 %v840_v19, %v839_v12  ;;  %v2638_v26 = vpop.f32.mrb[4].mxu1 }
  0xfc   : > { %v814_v3 = vmax.f32 %v580_v60, 0.0  ;;  %v705_v28 = vadd.f32 %v2638_v26, %v3191_v38  ;;  %v696_v29 = vpop.f32.mrb[5].mxu1 }
  0xfd   : > { %v812_v7 = vmax.f32 %v572_v63, 0.0  ;;  %v697_v32 = vadd.f32 %v3191_v38, %v696_v29  ;;  %v2639_v33 = vpop.f32.mrb[6].mxu1 }
  0xfe   : > { %v874_v11 = vpack.c.bf16 %v814_v3, %v813_v2  ;;  %v845_v36 = vmax.f32 %v705_v28, 0.0  ;;  %v708_v37 = vadd.f32 %v2639_v33, %v3191_v38  ;;  %v699_v39 = vpop.f32.mrb[7].mxu1 }
  0xff   : > { %v873_v14 = vpack.c.bf16 %v812_v7, %v811_v6  ;;  %v2610_v15 = vpop.f32.mrb[8].mxu0  ;;  %v843_v41 = vmax.f32 %v697_v32, 0.0  ;;  %v700_v42 = vadd.f32 %v3191_v38, %v699_v39 }
 0x100   : > { %v593_v17 = vadd.f32 %v2610_v15, %v3191_v38  ;;  %v584_v18 = vpop.f32.mrb[9].mxu0  ;;  %v846_v45 = vmax.f32 %v708_v37, 0.0 }
 0x101   : > { %v585_v20 = vadd.f32 %v3191_v38, %v584_v18  ;;  %v2611_v21 = vpop.f32.mrb[10].mxu0  ;;  %2676 = vmatprep.mubr.msk.bf16.mxu1 %vm942_vm1, %v873_v14  ;;  %v844_v48 = vmax.f32 %v700_v42, 0.0 }
 0x102   : > { %v596_v23 = vadd.f32 %v2611_v21, %v3191_v38  ;;  %v587_v24 = vpop.f32.mrb[11].mxu0  ;;  %2677 = vmatmul.mubr.msk.bf16.gmra.mrb[36].mxu1 %vm942_vm1, %v874_v11  ;;  %v817_v30 = vmax.f32 %v593_v17, 0.0  ;;  %v3230_v51 = vpack.c.bf16 %v846_v45, %v845_v36 }
 0x103   : > { %v588_v27 = vadd.f32 %v3191_v38, %v587_v24  ;;  %v815_v34 = vmax.f32 %v585_v20, 0.0  ;;  %v3234_v54 = vpack.c.bf16 %v844_v48, %v843_v41  ;;  %v2642_v55 = vpop.f32.mrb[8].mxu1 }
 0x104   : > { %v818_v31 = vmax.f32 %v596_v23, 0.0  ;;  %v721_v57 = vadd.f32 %v2642_v55, %v3191_v38  ;;  %v712_v58 = vpop.f32.mrb[9].mxu1 }
 0x105   : > { %v816_v35 = vmax.f32 %v588_v27, 0.0  ;;  %v713_v61 = vadd.f32 %v3191_v38, %v712_v58  ;;  %v2643_v62 = vpop.f32.mrb[10].mxu1 }
 0x106   : > { %v876_v40 = vpack.c.bf16 %v818_v31, %v817_v30  ;;  %v849_v1 = vmax.f32 %v721_v57, 0.0  ;;  %v724_v2 = vadd.f32 %v2643_v62, %v3191_v38  ;;  %v715_v3 = vpop.f32.mrb[11].mxu1 }
 0x107   : > { %v875_v43 = vpack.c.bf16 %v816_v35, %v815_v34  ;;  %v2614_v44 = vpop.f32.mrb[12].mxu0  ;;  %v847_v5 = vmax.f32 %v713_v61, 0.0  ;;  %v716_v6 = vadd.f32 %v3191_v38, %v715_v3 }
 0x108   : > { %v609_v46 = vadd.f32 %v2614_v44, %v3191_v38  ;;  %v600_v47 = vpop.f32.mrb[13].mxu0  ;;  %v850_v9 = vmax.f32 %v724_v2, 0.0 }
 0x109   : > { %v601_v49 = vadd.f32 %v3191_v38, %v600_v47  ;;  %v2615_v50 = vpop.f32.mrb[14].mxu0  ;;  %2680 = vmatprep.mubr.msk.bf16.mxu1 %vm942_vm1, %v875_v43  ;;  %v848_v12 = vmax.f32 %v716_v6, 0.0 }
 0x10a   : > { %v612_v52 = vadd.f32 %v2615_v50, %v3191_v38  ;;  %v603_v53 = vpop.f32.mrb[15].mxu0  ;;  %2681 = vmatmul.mubr.msk.bf16.gmra.mrb[40].mxu1 %vm942_vm1, %v876_v40  ;;  %v821_v59 = vmax.f32 %v609_v46, 0.0  ;;  %v3244_v15 = vpack.c.bf16 %v850_v9, %v849_v1 }
 0x10b   : > { %v604_v56 = vadd.f32 %v3191_v38, %v603_v53  ;;  %v819_v63 = vmax.f32 %v601_v49, 0.0  ;;  %v3248_v18 = vpack.c.bf16 %v848_v12, %v847_v5  ;;  %v2646_v19 = vpop.f32.mrb[12].mxu1 }
 0x10c   : > { %v822_v60 = vmax.f32 %v612_v52, 0.0  ;;  %v737_v21 = vadd.f32 %v2646_v19, %v3191_v38  ;;  %v728_v23 = vpop.f32.mrb[13].mxu1 }
 0x10d   : > { %v820_v0 = vmax.f32 %v604_v56, 0.0  ;;  %v729_v27 = vadd.f32 %v3191_v38, %v728_v23  ;;  %v2647_v28 = vpop.f32.mrb[14].mxu1 }
 0x10e   : > { %v878_v4 = vpack.c.bf16 %v822_v60, %v821_v59  ;;  %v853_v31 = vmax.f32 %v737_v21, 0.0  ;;  %v740_v32 = vadd.f32 %v2647_v28, %v3191_v38  ;;  %v731_v33 = vpop.f32.mrb[15].mxu1 }
 0x10f   : > { %v877_v7 = vpack.c.bf16 %v820_v0, %v819_v63  ;;  %v2618_v8 = vpop.f32.mrb[16].mxu0  ;;  %v851_v35 = vmax.f32 %v729_v27, 0.0  ;;  %v732_v36 = vadd.f32 %v3191_v38, %v731_v33 }
 0x110   : > { %v625_v10 = vadd.f32 %v2618_v8, %v3191_v38  ;;  %v616_v11 = vpop.f32.mrb[17].mxu0  ;;  %v854_v40 = vmax.f32 %v740_v32, 0.0 }
 0x111   : > { %v617_v13 = vadd.f32 %v3191_v38, %v616_v11  ;;  %v2619_v14 = vpop.f32.mrb[18].mxu0  ;;  %2684 = vmatprep.mubr.msk.bf16.mxu1 %vm942_vm1, %v877_v7  ;;  %v852_v43 = vmax.f32 %v732_v36, 0.0 }
 0x112   : > { %v628_v16 = vadd.f32 %v2619_v14, %v3191_v38  ;;  %v619_v17 = vpop.f32.mrb[19].mxu0  ;;  %2685 = vmatmul.mubr.msk.bf16.gmra.mrb[44].mxu1 %vm942_vm1, %v878_v4  ;;  %v825_v24 = vmax.f32 %v625_v10, 0.0  ;;  %v3258_v46 = vpack.c.bf16 %v854_v40, %v853_v31 }
 0x113   : > { %v620_v20 = vadd.f32 %v3191_v38, %v619_v17  ;;  %v823_v29 = vmax.f32 %v617_v13, 0.0  ;;  %v3262_v49 = vpack.c.bf16 %v852_v43, %v851_v35  ;;  %v2650_v50 = vpop.f32.mrb[16].mxu1 }
 0x114   : > { %v826_v26 = vmax.f32 %v628_v16, 0.0  ;;  %v753_v53 = vadd.f32 %v2650_v50, %v3191_v38  ;;  %v744_v55 = vpop.f32.mrb[17].mxu1 }
 0x115   : > { %v824_v30 = vmax.f32 %v620_v20, 0.0  ;;  %v745_v58 = vadd.f32 %v3191_v38, %v744_v55  ;;  %v2651_v59 = vpop.f32.mrb[18].mxu1 }
 0x116   : > { %v880_v34 = vpack.c.bf16 %v826_v26, %v825_v24  ;;  %v857_v62 = vmax.f32 %v753_v53, 0.0  ;;  %v756_v63 = vadd.f32 %v2651_v59, %v3191_v38  ;;  %v747_v0 = vpop.f32.mrb[19].mxu1 }
 0x117   : > { %v879_v37 = vpack.c.bf16 %v824_v30, %v823_v29  ;;  %v2622_v39 = vpop.f32.mrb[20].mxu0  ;;  %v855_v2 = vmax.f32 %v745_v58, 0.0  ;;  %v748_v3 = vadd.f32 %v3191_v38, %v747_v0 }
 0x118   : > { %v641_v41 = vadd.f32 %v2622_v39, %v3191_v38  ;;  %v632_v42 = vpop.f32.mrb[21].mxu0  ;;  %v858_v6 = vmax.f32 %v756_v63, 0.0 }
 0x119   : > { %v633_v44 = vadd.f32 %v3191_v38, %v632_v42  ;;  %v2623_v45 = vpop.f32.mrb[22].mxu0  ;;  %2688 = vmatprep.mubr.msk.bf16.mxu1 %vm942_vm1, %v879_v37  ;;  %v856_v9 = vmax.f32 %v748_v3, 0.0 }
 0x11a   : > { %v644_v47 = vadd.f32 %v2623_v45, %v3191_v38  ;;  %v635_v48 = vpop.f32.mrb[23].mxu0  ;;  %2689 = vmatmul.mubr.msk.bf16.gmra.mrb[48].mxu1 %vm942_vm1, %v880_v34  ;;  %v829_v56 = vmax.f32 %v641_v41, 0.0  ;;  %v3272_v12 = vpack.c.bf16 %v858_v6, %v857_v62 }
 0x11b   : > { %v636_v52 = vadd.f32 %v3191_v38, %v635_v48  ;;  %v827_v60 = vmax.f32 %v633_v44, 0.0  ;;  %v3276_v16 = vpack.c.bf16 %v856_v9, %v855_v2  ;;  %v2654_v17 = vpop.f32.mrb[20].mxu1 }
 0x11c   : > { %v830_v57 = vmax.f32 %v644_v47, 0.0  ;;  %v769_v20 = vadd.f32 %v2654_v17, %v3191_v38  ;;  %v760_v21 = vpop.f32.mrb[21].mxu1 }
 0x11d   : > { %v828_v61 = vmax.f32 %v636_v52, 0.0  ;;  %v761_v26 = vadd.f32 %v3191_v38, %v760_v21  ;;  %v2655_v27 = vpop.f32.mrb[22].mxu1 }
 0x11e   : > { %v882_v1 = vpack.c.bf16 %v830_v57, %v829_v56  ;;  %v861_v30 = vmax.f32 %v769_v20, 0.0  ;;  %v772_v31 = vadd.f32 %v2655_v27, %v3191_v38  ;;  %v763_v32 = vpop.f32.mrb[23].mxu1 }
 0x11f   : > { %v881_v4 = vpack.c.bf16 %v828_v61, %v827_v60  ;;  %v2626_v5 = vpop.f32.mrb[24].mxu0  ;;  %v859_v34 = vmax.f32 %v761_v26, 0.0  ;;  %v764_v35 = vadd.f32 %v3191_v38, %v763_v32 }
 0x120   : > { %v657_v7 = vadd.f32 %v2626_v5, %v3191_v38  ;;  %v648_v8 = vpop.f32.mrb[25].mxu0  ;;  %v862_v39 = vmax.f32 %v772_v31, 0.0 }
 0x121   : > { %v649_v10 = vadd.f32 %v3191_v38, %v648_v8  ;;  %v2627_v11 = vpop.f32.mrb[26].mxu0  ;;  %2692 = vmatprep.mubr.msk.bf16.mxu1 %vm942_vm1, %v881_v4  ;;  %v860_v42 = vmax.f32 %v764_v35, 0.0 }
 0x122   : > { %v660_v13 = vadd.f32 %v2627_v11, %v3191_v38  ;;  %v651_v14 = vpop.f32.mrb[27].mxu0  ;;  %2693 = vmatmul.mubr.msk.bf16.gmra.mrb[52].mxu1 %vm942_vm1, %v882_v1  ;;  %v833_v23 = vmax.f32 %v657_v7, 0.0  ;;  %v898_v45 = vpack.c.bf16 %v862_v39, %v861_v30 }
 0x123   : > { %v652_v19 = vadd.f32 %v3191_v38, %v651_v14  ;;  %v831_v28 = vmax.f32 %v649_v10, 0.0  ;;  %v897_v50 = vpack.c.bf16 %v860_v42, %v859_v34  ;;  %v2658_v52 = vpop.f32.mrb[24].mxu1 }
 0x124   : > { %v834_v24 = vmax.f32 %v660_v13, 0.0  ;;  %v785_v55 = vadd.f32 %v2658_v52, %v3191_v38  ;;  %v776_v56 = vpop.f32.mrb[25].mxu1 }
 0x125   : > { %v832_v29 = vmax.f32 %v652_v19, 0.0  ;;  %v777_v59 = vadd.f32 %v3191_v38, %v776_v56  ;;  %v2659_v60 = vpop.f32.mrb[26].mxu1 }
 0x126   : > { %v884_v33 = vpack.c.bf16 %v834_v24, %v833_v23  ;;  %v865_v63 = vmax.f32 %v785_v55, 0.0  ;;  %v788_v0 = vadd.f32 %v2659_v60, %v3191_v38  ;;  %v779_v1 = vpop.f32.mrb[27].mxu1 }
 0x127   : > { %v883_v36 = vpack.c.bf16 %v832_v29, %v831_v28  ;;  %v2630_v37 = vpop.f32.mrb[28].mxu0  ;;  %v863_v3 = vmax.f32 %v777_v59, 0.0  ;;  %v780_v4 = vadd.f32 %v3191_v38, %v779_v1 }
 0x128   : > { %v673_v40 = vadd.f32 %v2630_v37, %v3191_v38  ;;  %v664_v41 = vpop.f32.mrb[29].mxu0  ;;  %v866_v6 = vmax.f32 %v788_v0, 0.0 }
 0x129   : > { %v665_v43 = vadd.f32 %v3191_v38, %v664_v41  ;;  %v2631_v44 = vpop.f32.mrb[30].mxu0  ;;  %2696 = vmatprep.mubr.msk.bf16.mxu1 %vm942_vm1, %v883_v36  ;;  %v864_v7 = vmax.f32 %v780_v4, 0.0 }
 0x12a   : > { %v676_v47 = vadd.f32 %v2631_v44, %v3191_v38  ;;  %v667_v48 = vpop.f32.mrb[31].mxu0  ;;  %2697 = vmatmul.mubr.msk.bf16.gmra.mrb[56].mxu1 %vm942_vm1, %v884_v33  ;;  %v837_v57 = vmax.f32 %v673_v40, 0.0  ;;  %v900_v8 = vpack.c.bf16 %v866_v6, %v865_v63 }
 0x12b   : > { %v668_v53 = vadd.f32 %v3191_v38, %v667_v48  ;;  %v835_v61 = vmax.f32 %v665_v43, 0.0  ;;  %v899_v9 = vpack.c.bf16 %v864_v7, %v863_v3  ;;  %v2662_v10 = vpop.f32.mrb[28].mxu1 }
 0x12c   : > { %v838_v58 = vmax.f32 %v676_v47, 0.0  ;;  %v801_v11 = vadd.f32 %v2662_v10, %v3191_v38  ;;  %v792_v13 = vpop.f32.mrb[29].mxu1 }
 0x12d   : > { %v836_v62 = vmax.f32 %v668_v53, 0.0  ;;  %v793_v14 = vadd.f32 %v3191_v38, %v792_v13  ;;  %v2663_v17 = vpop.f32.mrb[30].mxu1 }
 0x12e   : > { %v886_v2 = vpack.c.bf16 %v838_v58, %v837_v57  ;;  %v869_v19 = vmax.f32 %v801_v11, 0.0  ;;  %v804_v20 = vadd.f32 %v2663_v17, %v3191_v38  ;;  %v795_v21 = vpop.f32.mrb[31].mxu1 }
 0x12f   : > { %v885_v5 = vpack.c.bf16 %v836_v62, %v835_v61  ;;  %v867_v23 = vmax.f32 %v793_v14, 0.0  ;;  %v796_v24 = vadd.f32 %v3191_v38, %v795_v21  ;;  %v3328_v38 = vld [vmem:[%s3833_s4] ss:$0 sm:$0xff] }
 0x130   : > { %v870_v26 = vmax.f32 %v804_v20, 0.0 }
 0x131   : > { %2700 = vmatprep.mubr.msk.bf16.mxu1 %vm942_vm1, %v885_v5  ;;  %v868_v27 = vmax.f32 %v796_v24, 0.0 }
 0x132   : > { %2701 = vmatmul.mubr.msk.bf16.gmra.mrb[60].mxu1 %vm942_vm1, %v886_v2  ;;  %v902_v28 = vpack.c.bf16 %v870_v26, %v869_v19 }
 0x133   : > { %2704 = vmatprep.mubr.msk.bf16.mxu1 %vm942_vm1, %v3220_v25  ;;  %v901_v25 = vpack.c.bf16 %v868_v27, %v867_v23 }
 0x13a   : > { %2705 = vmatmul.mubr.msk.bf16.gmra.mrb[64].mxu1 %vm942_vm1, %v3216_v22 }
 0x13b   : > { %2708 = vmatprep.mubr.msk.bf16.mxu1 %vm942_vm1, %v3234_v54 }
 0x142   : > { %2709 = vmatmul.mubr.msk.bf16.gmra.mrb[68].mxu1 %vm942_vm1, %v3230_v51 }
 0x143   : > { %2712 = vmatprep.mubr.msk.bf16.mxu1 %vm942_vm1, %v3248_v18 }
 0x14a   : > { %2713 = vmatmul.mubr.msk.bf16.gmra.mrb[72].mxu1 %vm942_vm1, %v3244_v15 }
 0x14b   : > { %2716 = vmatprep.mubr.msk.bf16.mxu1 %vm942_vm1, %v3262_v49 }
 0x152   : > { %2717 = vmatmul.mubr.msk.bf16.gmra.mrb[76].mxu1 %vm942_vm1, %v3258_v46 }
 0x153   : > { %2720 = vmatprep.mubr.msk.bf16.mxu1 %vm942_vm1, %v3276_v16 }
 0x15a   : > { %2721 = vmatmul.mubr.msk.bf16.gmra.mrb[80].mxu1 %vm942_vm1, %v3272_v12 }
 0x15b   : > { %2724 = vmatprep.mubr.msk.bf16.mxu1 %vm942_vm1, %v897_v50 }
 0x162   : > { %2725 = vmatmul.mubr.msk.bf16.gmra.mrb[84].mxu1 %vm942_vm1, %v898_v45 }
 0x163   : > { %2728 = vmatprep.mubr.msk.bf16.mxu1 %vm942_vm1, %v899_v9 }
 0x16a   : > { %2729 = vmatmul.mubr.msk.bf16.gmra.mrb[88].mxu1 %vm942_vm1, %v900_v8 }
 0x16b   : > { %2732 = vmatprep.mubr.msk.bf16.mxu1 %vm942_vm1, %v901_v25 }
 0x172   : > { %2733 = vmatmul.mubr.msk.bf16.gmra.mrb[92].mxu1 %vm942_vm1, %v902_v28 }
 0x1cd   : > { %v2674_v22 = vpop.f32.mrb[32].mxu1 }
 0x1ce   : > { %v1082_v51 = vadd.f32 %v2674_v22, %v3328_v38  ;;  %v1073_v54 = vpop.f32.mrb[33].mxu1 }
 0x1cf   : > { %v1074_v15 = vadd.f32 %v3328_v38, %v1073_v54  ;;  %v2675_v18 = vpop.f32.mrb[34].mxu1 }
 0x1d0   : > { %v1085_v46 = vadd.f32 %v2675_v18, %v3328_v38  ;;  %v1076_v49 = vpop.f32.mrb[35].mxu1  ;;  %v1330_v16 = vmax.f32 %v1082_v51, 0.0 }
 0x1d1   : > { %v1077_v12 = vadd.f32 %v3328_v38, %v1076_v49  ;;  %v1328_v30 = vmax.f32 %v1074_v15, 0.0 }
 0x1d2   : > { %v1331_v29 = vmax.f32 %v1085_v46, 0.0 }
 0x1d3   : > { %v1329_v31 = vmax.f32 %v1077_v12, 0.0 }
 0x1d4   : > { %v1393_v32 = vpack.c.bf16 %v1331_v29, %v1330_v16 }
 0x1d5   : > { %v1392_v33 = vpack.c.bf16 %v1329_v31, %v1328_v30  ;;  %v2678_v34 = vpop.f32.mrb[36].mxu1 }
 0x1d6   : > { %v1098_v35 = vadd.f32 %v2678_v34, %v3328_v38  ;;  %v1089_v36 = vpop.f32.mrb[37].mxu1 }
 0x1d7   : > { %v1090_v37 = vadd.f32 %v3328_v38, %v1089_v36  ;;  %v2679_v39 = vpop.f32.mrb[38].mxu1  ;;  %2740 = vmatprep.mubr.msk.bf16.mxu0 %vm421_vm0, %v1392_v33 }
 0x1d8   : > { %v1101_v40 = vadd.f32 %v2679_v39, %v3328_v38  ;;  %v1092_v41 = vpop.f32.mrb[39].mxu1  ;;  %2741 = vmatmul.mubr.msk.bf16.vlgmr.msra.gmra.mrb[32].mxu0 %vm421_vm0, %v1393_v32  ;;  %v1334_v43 = vmax.f32 %v1098_v35, 0.0 }
 0x1d9   : > { %v1093_v42 = vadd.f32 %v3328_v38, %v1092_v41  ;;  %v1332_v45 = vmax.f32 %v1090_v37, 0.0 }
 0x1da   : > { %v1335_v44 = vmax.f32 %v1101_v40, 0.0 }
 0x1db   : > { %v1333_v47 = vmax.f32 %v1093_v42, 0.0 }
 0x1dc   : > { %v1395_v48 = vpack.c.bf16 %v1335_v44, %v1334_v43 }
 0x1dd   : > { %v1394_v50 = vpack.c.bf16 %v1333_v47, %v1332_v45  ;;  %v2682_v52 = vpop.f32.mrb[40].mxu1 }
 0x1de   : > { %v1114_v53 = vadd.f32 %v2682_v52, %v3328_v38  ;;  %v1105_v55 = vpop.f32.mrb[41].mxu1 }
 0x1df   : > { %v1106_v56 = vadd.f32 %v3328_v38, %v1105_v55  ;;  %v2683_v57 = vpop.f32.mrb[42].mxu1  ;;  %2744 = vmatprep.mubr.msk.bf16.mxu0 %vm421_vm0, %v1394_v50 }
 0x1e0   : > { %v1117_v58 = vadd.f32 %v2683_v57, %v3328_v38  ;;  %v1108_v59 = vpop.f32.mrb[43].mxu1  ;;  %2745 = vmatmul.mubr.msk.bf16.gmra.mrb[36].mxu0 %vm421_vm0, %v1395_v48  ;;  %v1338_v61 = vmax.f32 %v1114_v53, 0.0 }
 0x1e1   : > { %v1109_v60 = vadd.f32 %v3328_v38, %v1108_v59  ;;  %v1336_v63 = vmax.f32 %v1106_v56, 0.0 }
 0x1e2   : > { %v1339_v62 = vmax.f32 %v1117_v58, 0.0 }
 0x1e3   : > { %v1337_v0 = vmax.f32 %v1109_v60, 0.0 }
 0x1e4   : > { %v1397_v1 = vpack.c.bf16 %v1339_v62, %v1338_v61 }
 0x1e5   : > { %v1396_v2 = vpack.c.bf16 %v1337_v0, %v1336_v63  ;;  %v2686_v3 = vpop.f32.mrb[44].mxu1 }
 0x1e6   : > { %v1130_v4 = vadd.f32 %v2686_v3, %v3328_v38  ;;  %v1121_v5 = vpop.f32.mrb[45].mxu1 }
 0x1e7   : > { %v1122_v6 = vadd.f32 %v3328_v38, %v1121_v5  ;;  %v2687_v7 = vpop.f32.mrb[46].mxu1  ;;  %2748 = vmatprep.mubr.msk.bf16.mxu0 %vm421_vm0, %v1396_v2 }
 0x1e8   : > { %v1133_v8 = vadd.f32 %v2687_v7, %v3328_v38  ;;  %v1124_v9 = vpop.f32.mrb[47].mxu1  ;;  %2749 = vmatmul.mubr.msk.bf16.gmra.mrb[40].mxu0 %vm421_vm0, %v1397_v1  ;;  %v1342_v11 = vmax.f32 %v1130_v4, 0.0 }
 0x1e9   : > { %v1125_v10 = vadd.f32 %v3328_v38, %v1124_v9  ;;  %v1340_v14 = vmax.f32 %v1122_v6, 0.0 }
 0x1ea   : > { %v1343_v13 = vmax.f32 %v1133_v8, 0.0 }
 0x1eb   : > { %v1341_v17 = vmax.f32 %v1125_v10, 0.0 }
 0x1ec   : > { %v1399_v19 = vpack.c.bf16 %v1343_v13, %v1342_v11 }
 0x1ed   : > { %v1398_v20 = vpack.c.bf16 %v1341_v17, %v1340_v14  ;;  %v2690_v21 = vpop.f32.mrb[48].mxu1 }
 0x1ee   : > { %v1146_v23 = vadd.f32 %v2690_v21, %v3328_v38  ;;  %v1137_v24 = vpop.f32.mrb[49].mxu1 }
 0x1ef   : > { %v1138_v26 = vadd.f32 %v3328_v38, %v1137_v24  ;;  %v2691_v27 = vpop.f32.mrb[50].mxu1  ;;  %2752 = vmatprep.mubr.msk.bf16.mxu0 %vm421_vm0, %v1398_v20 }
 0x1f0   : > { %v1149_v28 = vadd.f32 %v2691_v27, %v3328_v38  ;;  %v1140_v25 = vpop.f32.mrb[51].mxu1  ;;  %2753 = vmatmul.mubr.msk.bf16.gmra.mrb[44].mxu0 %vm421_vm0, %v1399_v19  ;;  %v1346_v51 = vmax.f32 %v1146_v23, 0.0 }
 0x1f1   : > { %v1141_v22 = vadd.f32 %v3328_v38, %v1140_v25  ;;  %v1344_v15 = vmax.f32 %v1138_v26, 0.0 }
 0x1f2   : > { %v1347_v54 = vmax.f32 %v1149_v28, 0.0 }
 0x1f3   : > { %v1345_v18 = vmax.f32 %v1141_v22, 0.0 }
 0x1f4   : > { %v1401_v46 = vpack.c.bf16 %v1347_v54, %v1346_v51 }
 0x1f5   : > { %v1400_v49 = vpack.c.bf16 %v1345_v18, %v1344_v15  ;;  %v2694_v12 = vpop.f32.mrb[52].mxu1 }
 0x1f6   : > { %v1162_v16 = vadd.f32 %v2694_v12, %v3328_v38  ;;  %v1153_v29 = vpop.f32.mrb[53].mxu1 }
 0x1f7   : > { %v1154_v30 = vadd.f32 %v3328_v38, %v1153_v29  ;;  %v2695_v31 = vpop.f32.mrb[54].mxu1  ;;  %2756 = vmatprep.mubr.msk.bf16.mxu0 %vm421_vm0, %v1400_v49 }
 0x1f8   : > { %v1165_v32 = vadd.f32 %v2695_v31, %v3328_v38  ;;  %v1156_v33 = vpop.f32.mrb[55].mxu1  ;;  %2757 = vmatmul.mubr.msk.bf16.gmra.mrb[48].mxu0 %vm421_vm0, %v1401_v46  ;;  %v1350_v35 = vmax.f32 %v1162_v16, 0.0 }
 0x1f9   : > { %v1157_v34 = vadd.f32 %v3328_v38, %v1156_v33  ;;  %v1348_v37 = vmax.f32 %v1154_v30, 0.0 }
 0x1fa   : > { %v1351_v36 = vmax.f32 %v1165_v32, 0.0 }
 0x1fb   : > { %v1349_v39 = vmax.f32 %v1157_v34, 0.0 }
 0x1fc   : > { %v1403_v40 = vpack.c.bf16 %v1351_v36, %v1350_v35 }
 0x1fd   : > { %v1402_v41 = vpack.c.bf16 %v1349_v39, %v1348_v37  ;;  %v2698_v42 = vpop.f32.mrb[56].mxu1 }
 0x1fe   : > { %v1178_v43 = vadd.f32 %v2698_v42, %v3328_v38  ;;  %v1169_v44 = vpop.f32.mrb[57].mxu1 }
 0x1ff   : > { %v1170_v45 = vadd.f32 %v3328_v38, %v1169_v44  ;;  %v2699_v47 = vpop.f32.mrb[58].mxu1  ;;  %2760 = vmatprep.mubr.msk.bf16.mxu0 %vm421_vm0, %v1402_v41 }
 0x200   : > { %v1181_v48 = vadd.f32 %v2699_v47, %v3328_v38  ;;  %v1172_v50 = vpop.f32.mrb[59].mxu1  ;;  %2761 = vmatmul.mubr.msk.bf16.gmra.mrb[52].mxu0 %vm421_vm0, %v1403_v40  ;;  %v1354_v53 = vmax.f32 %v1178_v43, 0.0 }
 0x201   : > { %v1173_v52 = vadd.f32 %v3328_v38, %v1172_v50  ;;  %v1352_v56 = vmax.f32 %v1170_v45, 0.0 }
 0x202   : > { %v1355_v55 = vmax.f32 %v1181_v48, 0.0 }
 0x203   : > { %v1353_v57 = vmax.f32 %v1173_v52, 0.0 }
 0x204   : > { %v1405_v58 = vpack.c.bf16 %v1355_v55, %v1354_v53 }
 0x205   : > { %v1404_v59 = vpack.c.bf16 %v1353_v57, %v1352_v56  ;;  %v2702_v60 = vpop.f32.mrb[60].mxu1 }
 0x206   : > { %v1194_v61 = vadd.f32 %v2702_v60, %v3328_v38  ;;  %v1185_v62 = vpop.f32.mrb[61].mxu1 }
 0x207   : > { %v1186_v63 = vadd.f32 %v3328_v38, %v1185_v62  ;;  %v2703_v0 = vpop.f32.mrb[62].mxu1  ;;  %2764 = vmatprep.mubr.msk.bf16.mxu0 %vm421_vm0, %v1404_v59 }
 0x208   : > { %v1197_v1 = vadd.f32 %v2703_v0, %v3328_v38  ;;  %v1188_v2 = vpop.f32.mrb[63].mxu1  ;;  %2765 = vmatmul.mubr.msk.bf16.gmra.mrb[56].mxu0 %vm421_vm0, %v1405_v58  ;;  %v1358_v4 = vmax.f32 %v1194_v61, 0.0 }
 0x209   : > { %v1189_v3 = vadd.f32 %v3328_v38, %v1188_v2  ;;  %v1356_v6 = vmax.f32 %v1186_v63, 0.0 }
 0x20a   : > { %v1359_v5 = vmax.f32 %v1197_v1, 0.0 }
 0x20b   : > { %v1357_v7 = vmax.f32 %v1189_v3, 0.0 }
 0x20c   : > { %v1407_v8 = vpack.c.bf16 %v1359_v5, %v1358_v4 }
 0x20d   : > { %v1406_v9 = vpack.c.bf16 %v1357_v7, %v1356_v6  ;;  %v2706_v10 = vpop.f32.mrb[64].mxu1 }
 0x20e   : > { %v1210_v11 = vadd.f32 %v2706_v10, %v3328_v38  ;;  %v1201_v13 = vpop.f32.mrb[65].mxu1 }
 0x20f   : > { %v1202_v14 = vadd.f32 %v3328_v38, %v1201_v13  ;;  %v2707_v17 = vpop.f32.mrb[66].mxu1  ;;  %2768 = vmatprep.mubr.msk.bf16.mxu0 %vm421_vm0, %v1406_v9 }
 0x210   : > { %v1213_v19 = vadd.f32 %v2707_v17, %v3328_v38  ;;  %v1204_v20 = vpop.f32.mrb[67].mxu1  ;;  %2769 = vmatmul.mubr.msk.bf16.gmra.mrb[60].mxu0 %vm421_vm0, %v1407_v8  ;;  %v1362_v23 = vmax.f32 %v1210_v11, 0.0 }
 0x211   : > { %v1205_v21 = vadd.f32 %v3328_v38, %v1204_v20  ;;  %v1360_v26 = vmax.f32 %v1202_v14, 0.0 }
 0x212   : > { %v1363_v24 = vmax.f32 %v1213_v19, 0.0 }
 0x213   : > { %v1361_v27 = vmax.f32 %v1205_v21, 0.0 }
 0x214   : > { %v1409_v28 = vpack.c.bf16 %v1363_v24, %v1362_v23 }
 0x215   : > { %v1408_v25 = vpack.c.bf16 %v1361_v27, %v1360_v26  ;;  %v2710_v22 = vpop.f32.mrb[68].mxu1 }
 0x216   : > { %v1226_v51 = vadd.f32 %v2710_v22, %v3328_v38  ;;  %v1217_v54 = vpop.f32.mrb[69].mxu1 }
 0x217   : > { %v1218_v15 = vadd.f32 %v3328_v38, %v1217_v54  ;;  %v2711_v18 = vpop.f32.mrb[70].mxu1  ;;  %2772 = vmatprep.mubr.msk.bf16.mxu0 %vm421_vm0, %v1408_v25 }
 0x218   : > { %v1229_v46 = vadd.f32 %v2711_v18, %v3328_v38  ;;  %v1220_v49 = vpop.f32.mrb[71].mxu1  ;;  %2773 = vmatmul.mubr.msk.bf16.gmra.mrb[64].mxu0 %vm421_vm0, %v1409_v28  ;;  %v1366_v16 = vmax.f32 %v1226_v51, 0.0 }
 0x219   : > { %v1221_v12 = vadd.f32 %v3328_v38, %v1220_v49  ;;  %v1364_v30 = vmax.f32 %v1218_v15, 0.0 }
 0x21a   : > { %v1367_v29 = vmax.f32 %v1229_v46, 0.0 }
 0x21b   : > { %v1365_v31 = vmax.f32 %v1221_v12, 0.0 }
 0x21c   : > { %v1411_v32 = vpack.c.bf16 %v1367_v29, %v1366_v16 }
 0x21d   : > { %v1410_v33 = vpack.c.bf16 %v1365_v31, %v1364_v30  ;;  %v2714_v34 = vpop.f32.mrb[72].mxu1 }
 0x21e   : > { %v1242_v35 = vadd.f32 %v2714_v34, %v3328_v38  ;;  %v1233_v36 = vpop.f32.mrb[73].mxu1 }
 0x21f   : > { %v1234_v37 = vadd.f32 %v3328_v38, %v1233_v36  ;;  %v2715_v39 = vpop.f32.mrb[74].mxu1  ;;  %2776 = vmatprep.mubr.msk.bf16.mxu0 %vm421_vm0, %v1410_v33 }
 0x220   : > { %v1245_v40 = vadd.f32 %v2715_v39, %v3328_v38  ;;  %v1236_v41 = vpop.f32.mrb[75].mxu1  ;;  %2777 = vmatmul.mubr.msk.bf16.gmra.mrb[68].mxu0 %vm421_vm0, %v1411_v32  ;;  %v1370_v43 = vmax.f32 %v1242_v35, 0.0 }
 0x221   : > { %v1237_v42 = vadd.f32 %v3328_v38, %v1236_v41  ;;  %v1368_v45 = vmax.f32 %v1234_v37, 0.0 }
 0x222   : > { %v1371_v44 = vmax.f32 %v1245_v40, 0.0 }
 0x223   : > { %v1369_v47 = vmax.f32 %v1237_v42, 0.0 }
 0x224   : > { %v1413_v48 = vpack.c.bf16 %v1371_v44, %v1370_v43 }
 0x225   : > { %v1412_v50 = vpack.c.bf16 %v1369_v47, %v1368_v45  ;;  %v2718_v52 = vpop.f32.mrb[76].mxu1 }
 0x226   : > { %v1258_v53 = vadd.f32 %v2718_v52, %v3328_v38  ;;  %v1249_v55 = vpop.f32.mrb[77].mxu1 }
 0x227   : > { %v1250_v56 = vadd.f32 %v3328_v38, %v1249_v55  ;;  %v2719_v57 = vpop.f32.mrb[78].mxu1  ;;  %2780 = vmatprep.mubr.msk.bf16.mxu0 %vm421_vm0, %v1412_v50 }
 0x228   : > { %v1261_v58 = vadd.f32 %v2719_v57, %v3328_v38  ;;  %v1252_v59 = vpop.f32.mrb[79].mxu1  ;;  %2781 = vmatmul.mubr.msk.bf16.gmra.mrb[72].mxu0 %vm421_vm0, %v1413_v48  ;;  %v1374_v61 = vmax.f32 %v1258_v53, 0.0 }
 0x229   : > { %v1253_v60 = vadd.f32 %v3328_v38, %v1252_v59  ;;  %v1372_v63 = vmax.f32 %v1250_v56, 0.0 }
 0x22a   : > { %v1375_v62 = vmax.f32 %v1261_v58, 0.0 }
 0x22b   : > { %v1373_v0 = vmax.f32 %v1253_v60, 0.0  ;;  %v3427_v60 = vstv %s1428_s20 }
 0x22c   : > { %v1415_v1 = vpack.c.bf16 %v1375_v62, %v1374_v61 }
 0x22d   : > { %v1414_v2 = vpack.c.bf16 %v1373_v0, %v1372_v63  ;;  %v2722_v3 = vpop.f32.mrb[80].mxu1 }
 0x22e   : > { %v1274_v4 = vadd.f32 %v2722_v3, %v3328_v38  ;;  %v1265_v5 = vpop.f32.mrb[81].mxu1 }
 0x22f   : > { %v1266_v6 = vadd.f32 %v3328_v38, %v1265_v5  ;;  %v2723_v7 = vpop.f32.mrb[82].mxu1  ;;  %2784 = vmatprep.mubr.msk.bf16.mxu0 %vm421_vm0, %v1414_v2 }
 0x230   : > { %v1277_v8 = vadd.f32 %v2723_v7, %v3328_v38  ;;  %v1268_v9 = vpop.f32.mrb[83].mxu1  ;;  %2785 = vmatmul.mubr.msk.bf16.gmra.mrb[76].mxu0 %vm421_vm0, %v1415_v1  ;;  %v1378_v11 = vmax.f32 %v1274_v4, 0.0 }
 0x231   : > { %v1269_v10 = vadd.f32 %v3328_v38, %v1268_v9  ;;  %v1376_v14 = vmax.f32 %v1266_v6, 0.0 }
 0x232   : > { %v1379_v13 = vmax.f32 %v1277_v8, 0.0 }
 0x233   : > { %v1377_v17 = vmax.f32 %v1269_v10, 0.0 }
 0x234   : > { %v1417_v19 = vpack.c.bf16 %v1379_v13, %v1378_v11 }
 0x235   : > { %v1416_v20 = vpack.c.bf16 %v1377_v17, %v1376_v14  ;;  %v2726_v21 = vpop.f32.mrb[84].mxu1 }
 0x236   : > { %v1290_v23 = vadd.f32 %v2726_v21, %v3328_v38  ;;  %v1281_v24 = vpop.f32.mrb[85].mxu1 }
 0x237   : > { %v1282_v26 = vadd.f32 %v3328_v38, %v1281_v24  ;;  %v2727_v27 = vpop.f32.mrb[86].mxu1  ;;  %2788 = vmatprep.mubr.msk.bf16.mxu0 %vm421_vm0, %v1416_v20 }
 0x238   : > { %v1293_v28 = vadd.f32 %v2727_v27, %v3328_v38  ;;  %v1284_v25 = vpop.f32.mrb[87].mxu1  ;;  %2789 = vmatmul.mubr.msk.bf16.gmra.mrb[80].mxu0 %vm421_vm0, %v1417_v19  ;;  %v1382_v51 = vmax.f32 %v1290_v23, 0.0 }
 0x239   : > { %v1285_v22 = vadd.f32 %v3328_v38, %v1284_v25  ;;  %v1380_v15 = vmax.f32 %v1282_v26, 0.0 }
 0x23a   : > { %v1383_v54 = vmax.f32 %v1293_v28, 0.0 }
 0x23b   : > { %v1381_v18 = vmax.f32 %v1285_v22, 0.0 }
 0x23c   : > { %v1419_v46 = vpack.c.bf16 %v1383_v54, %v1382_v51 }
 0x23d   : > { %v1418_v49 = vpack.c.bf16 %v1381_v18, %v1380_v15  ;;  %v2730_v12 = vpop.f32.mrb[88].mxu1 }
 0x23e   : > { %v1306_v16 = vadd.f32 %v2730_v12, %v3328_v38  ;;  %v1297_v29 = vpop.f32.mrb[89].mxu1 }
 0x23f   : > { %v1298_v30 = vadd.f32 %v3328_v38, %v1297_v29  ;;  %v2731_v31 = vpop.f32.mrb[90].mxu1  ;;  %2792 = vmatprep.mubr.msk.bf16.mxu0 %vm421_vm0, %v1418_v49 }
 0x240   : > { %v1309_v32 = vadd.f32 %v2731_v31, %v3328_v38  ;;  %v1300_v33 = vpop.f32.mrb[91].mxu1  ;;  %2793 = vmatmul.mubr.msk.bf16.gmra.mrb[84].mxu0 %vm421_vm0, %v1419_v46  ;;  %v1386_v35 = vmax.f32 %v1306_v16, 0.0 }
 0x241   : > { %v1301_v34 = vadd.f32 %v3328_v38, %v1300_v33  ;;  %v1384_v37 = vmax.f32 %v1298_v30, 0.0 }
 0x242   : > { %v1387_v36 = vmax.f32 %v1309_v32, 0.0 }
 0x243   : > { %v1385_v39 = vmax.f32 %v1301_v34, 0.0 }
 0x244   : > { %v1421_v40 = vpack.c.bf16 %v1387_v36, %v1386_v35 }
 0x245   : > { %v1420_v41 = vpack.c.bf16 %v1385_v39, %v1384_v37  ;;  %v2734_v42 = vpop.f32.mrb[92].mxu1 }
 0x246   : > { %v1322_v43 = vadd.f32 %v2734_v42, %v3328_v38  ;;  %v1313_v44 = vpop.f32.mrb[93].mxu1 }
 0x247   : > { %v1314_v45 = vadd.f32 %v3328_v38, %v1313_v44  ;;  %v2735_v47 = vpop.f32.mrb[94].mxu1  ;;  %2796 = vmatprep.mubr.msk.bf16.mxu0 %vm421_vm0, %v1420_v41 }
 0x248   : > { %v1325_v48 = vadd.f32 %v2735_v47, %v3328_v38  ;;  %v1316_v50 = vpop.f32.mrb[95].mxu1  ;;  %2797 = vmatmul.mubr.msk.bf16.gmra.mrb[88].mxu0 %vm421_vm0, %v1421_v40  ;;  %v1390_v53 = vmax.f32 %v1322_v43, 0.0 }
 0x249   : > { %v1317_v52 = vadd.f32 %v3328_v38, %v1316_v50  ;;  %v1388_v56 = vmax.f32 %v1314_v45, 0.0 }
 0x24a   : > { %v1391_v55 = vmax.f32 %v1325_v48, 0.0 }
 0x24b   : > { %v1389_v57 = vmax.f32 %v1317_v52, 0.0 }
 0x24c   : > { %v1423_v58 = vpack.c.bf16 %v1391_v55, %v1390_v53 }
 0x24d   : > { %v1422_v59 = vpack.c.bf16 %v1389_v57, %v1388_v56 }
 0x24f   : > { %2800 = vmatprep.mubr.msk.bf16.mxu0 %vm421_vm0, %v1422_v59 }
 0x250   : > { %2801 = vmatmul.mubr.msk.bf16.gmra.mrb[92].mxu0 %vm421_vm0, %v1423_v58 }
 0x2ab   : > { %v2742_v61 = vpop.f32.mrb[32].mxu0 }
 0x2ac   : > { %v1581_v62 = vadd.f32 %v2742_v61, %v3427_v60  ;;  %v1572_v38 = vpop.f32.mrb[33].mxu0 }
 0x2ad   : > { %v1573_v63 = vadd.f32 %v1572_v38, %v3427_v60  ;;  %v2743_v0 = vpop.f32.mrb[34].mxu0 }
 0x2ae   : > { %1830 = vst.msk [vmem:[%s3431_s23 + $0x10] sm:$0xff] %vm1827_vm2, %v1581_v62  ;;  %v1584_v1 = vadd.f32 %v2743_v0, %v3427_v60  ;;  %v1575_v2 = vpop.f32.mrb[35].mxu0 }
 0x2af   : > { %1828 = vst.msk [vmem:[%s3431_s23] sm:$0xff] %vm1827_vm2, %v1573_v63  ;;  %v1576_v3 = vadd.f32 %v1575_v2, %v3427_v60 }
 0x2b0   : > { %1831 = vst.msk [vmem:[%s3431_s23 + $0x18] sm:$0xff] %vm1827_vm2, %v1584_v1 }
 0x2b1   : > { %1829 = vst.msk [vmem:[%s3431_s23 + $0x8] sm:$0xff] %vm1827_vm2, %v1576_v3 }
 0x2b3   : > { %v2746_v4 = vpop.f32.mrb[36].mxu0 }
 0x2b4   : > { %v1597_v5 = vadd.f32 %v2746_v4, %v3427_v60  ;;  %v1588_v6 = vpop.f32.mrb[37].mxu0 }
 0x2b5   : > { %v1589_v7 = vadd.f32 %v1588_v6, %v3427_v60  ;;  %v2747_v8 = vpop.f32.mrb[38].mxu0 }
 0x2b6   : > { %1834 = vst.msk [vmem:[%s3431_s23 + $0x30] sm:$0xff] %vm1827_vm2, %v1597_v5  ;;  %v1600_v9 = vadd.f32 %v2747_v8, %v3427_v60  ;;  %v1591_v10 = vpop.f32.mrb[39].mxu0 }
 0x2b7   : > { %1832 = vst.msk [vmem:[%s3431_s23 + $0x20] sm:$0xff] %vm1827_vm2, %v1589_v7  ;;  %v1592_v11 = vadd.f32 %v1591_v10, %v3427_v60 }
 0x2b8   : > { %1835 = vst.msk [vmem:[%s3431_s23 + $0x38] sm:$0xff] %vm1827_vm2, %v1600_v9 }
 0x2b9   : > { %1833 = vst.msk [vmem:[%s3431_s23 + $0x28] sm:$0xff] %vm1827_vm2, %v1592_v11 }
 0x2bb   : > { %v2750_v13 = vpop.f32.mrb[40].mxu0 }
 0x2bc   : > { %v1613_v14 = vadd.f32 %v2750_v13, %v3427_v60  ;;  %v1604_v17 = vpop.f32.mrb[41].mxu0 }
 0x2bd   : > { %v1605_v19 = vadd.f32 %v1604_v17, %v3427_v60  ;;  %v2751_v20 = vpop.f32.mrb[42].mxu0 }
 0x2be   : > { %1838 = vst.msk [vmem:[%s3431_s23 + $0x50] sm:$0xff] %vm1827_vm2, %v1613_v14  ;;  %v1616_v21 = vadd.f32 %v2751_v20, %v3427_v60  ;;  %v1607_v23 = vpop.f32.mrb[43].mxu0 }
 0x2bf   : > { %1836 = vst.msk [vmem:[%s3431_s23 + $0x40] sm:$0xff] %vm1827_vm2, %v1605_v19  ;;  %v1608_v24 = vadd.f32 %v1607_v23, %v3427_v60 }
 0x2c0   : > { %1839 = vst.msk [vmem:[%s3431_s23 + $0x58] sm:$0xff] %vm1827_vm2, %v1616_v21 }
 0x2c1   : > { %1837 = vst.msk [vmem:[%s3431_s23 + $0x48] sm:$0xff] %vm1827_vm2, %v1608_v24 }
 0x2c3   : > { %v2754_v26 = vpop.f32.mrb[44].mxu0 }
 0x2c4   : > { %v1629_v27 = vadd.f32 %v2754_v26, %v3427_v60  ;;  %v1620_v28 = vpop.f32.mrb[45].mxu0 }
 0x2c5   : > { %v1621_v25 = vadd.f32 %v1620_v28, %v3427_v60  ;;  %v2755_v22 = vpop.f32.mrb[46].mxu0 }
 0x2c6   : > { %1842 = vst.msk [vmem:[%s3431_s23 + $0x70] sm:$0xff] %vm1827_vm2, %v1629_v27  ;;  %v1632_v51 = vadd.f32 %v2755_v22, %v3427_v60  ;;  %v1623_v54 = vpop.f32.mrb[47].mxu0 }
 0x2c7   : > { %1840 = vst.msk [vmem:[%s3431_s23 + $0x60] sm:$0xff] %vm1827_vm2, %v1621_v25  ;;  %v1624_v15 = vadd.f32 %v1623_v54, %v3427_v60 }
 0x2c8   : > { %1843 = vst.msk [vmem:[%s3431_s23 + $0x78] sm:$0xff] %vm1827_vm2, %v1632_v51 }
 0x2c9   : > { %1841 = vst.msk [vmem:[%s3431_s23 + $0x68] sm:$0xff] %vm1827_vm2, %v1624_v15 }
 0x2cb   : > { %v2758_v18 = vpop.f32.mrb[48].mxu0 }
 0x2cc   : > { %v1645_v46 = vadd.f32 %v2758_v18, %v3427_v60  ;;  %v1636_v49 = vpop.f32.mrb[49].mxu0 }
 0x2cd   : > { %v1637_v12 = vadd.f32 %v1636_v49, %v3427_v60  ;;  %v2759_v16 = vpop.f32.mrb[50].mxu0 }
 0x2ce   : > { %1846 = vst.msk [vmem:[%s3431_s23 + $0x90] sm:$0xff] %vm1827_vm2, %v1645_v46  ;;  %v1648_v29 = vadd.f32 %v2759_v16, %v3427_v60  ;;  %v1639_v30 = vpop.f32.mrb[51].mxu0 }
 0x2cf   : > { %1844 = vst.msk [vmem:[%s3431_s23 + $0x80] sm:$0xff] %vm1827_vm2, %v1637_v12  ;;  %v1640_v31 = vadd.f32 %v1639_v30, %v3427_v60 }
 0x2d0   : > { %1847 = vst.msk [vmem:[%s3431_s23 + $0x98] sm:$0xff] %vm1827_vm2, %v1648_v29 }
 0x2d1   : > { %1845 = vst.msk [vmem:[%s3431_s23 + $0x88] sm:$0xff] %vm1827_vm2, %v1640_v31 }
 0x2d3   : > { %v2762_v32 = vpop.f32.mrb[52].mxu0 }
 0x2d4   : > { %v1661_v33 = vadd.f32 %v2762_v32, %v3427_v60  ;;  %v1652_v34 = vpop.f32.mrb[53].mxu0 }
 0x2d5   : > { %v1653_v35 = vadd.f32 %v1652_v34, %v3427_v60  ;;  %v2763_v36 = vpop.f32.mrb[54].mxu0 }
 0x2d6   : > { %1850 = vst.msk [vmem:[%s3431_s23 + $0xb0] sm:$0xff] %vm1827_vm2, %v1661_v33  ;;  %v1664_v37 = vadd.f32 %v2763_v36, %v3427_v60  ;;  %v1655_v39 = vpop.f32.mrb[55].mxu0 }
 0x2d7   : > { %1848 = vst.msk [vmem:[%s3431_s23 + $0xa0] sm:$0xff] %vm1827_vm2, %v1653_v35  ;;  %v1656_v40 = vadd.f32 %v1655_v39, %v3427_v60 }
 0x2d8   : > { %1851 = vst.msk [vmem:[%s3431_s23 + $0xb8] sm:$0xff] %vm1827_vm2, %v1664_v37 }
 0x2d9   : > { %1849 = vst.msk [vmem:[%s3431_s23 + $0xa8] sm:$0xff] %vm1827_vm2, %v1656_v40 }
 0x2db   : > { %v2766_v41 = vpop.f32.mrb[56].mxu0 }
 0x2dc   : > { %v1677_v42 = vadd.f32 %v2766_v41, %v3427_v60  ;;  %v1668_v43 = vpop.f32.mrb[57].mxu0 }
 0x2dd   : > { %v1669_v44 = vadd.f32 %v1668_v43, %v3427_v60  ;;  %v2767_v45 = vpop.f32.mrb[58].mxu0 }
 0x2de   : > { %1854 = vst.msk [vmem:[%s3431_s23 + $0xd0] sm:$0xff] %vm1827_vm2, %v1677_v42  ;;  %v1680_v47 = vadd.f32 %v2767_v45, %v3427_v60  ;;  %v1671_v48 = vpop.f32.mrb[59].mxu0 }
 0x2df   : > { %1852 = vst.msk [vmem:[%s3431_s23 + $0xc0] sm:$0xff] %vm1827_vm2, %v1669_v44  ;;  %v1672_v50 = vadd.f32 %v1671_v48, %v3427_v60 }
 0x2e0   : > { %1855 = vst.msk [vmem:[%s3431_s23 + $0xd8] sm:$0xff] %vm1827_vm2, %v1680_v47 }
 0x2e1   : > { %1853 = vst.msk [vmem:[%s3431_s23 + $0xc8] sm:$0xff] %vm1827_vm2, %v1672_v50 }
 0x2e3   : > { %v2770_v52 = vpop.f32.mrb[60].mxu0 }
 0x2e4   : > { %v1693_v53 = vadd.f32 %v2770_v52, %v3427_v60  ;;  %v1684_v55 = vpop.f32.mrb[61].mxu0 }
 0x2e5   : > { %v1685_v56 = vadd.f32 %v1684_v55, %v3427_v60  ;;  %v2771_v57 = vpop.f32.mrb[62].mxu0 }
 0x2e6   : > { %1858 = vst.msk [vmem:[%s3431_s23 + $0xf0] sm:$0xff] %vm1827_vm2, %v1693_v53  ;;  %v1696_v58 = vadd.f32 %v2771_v57, %v3427_v60  ;;  %v1687_v59 = vpop.f32.mrb[63].mxu0 }
 0x2e7   : > { %1856 = vst.msk [vmem:[%s3431_s23 + $0xe0] sm:$0xff] %vm1827_vm2, %v1685_v56  ;;  %v1688_v61 = vadd.f32 %v1687_v59, %v3427_v60 }
 0x2e8   : > { %1859 = vst.msk [vmem:[%s3431_s23 + $0xf8] sm:$0xff] %vm1827_vm2, %v1696_v58 }
 0x2e9   : > { %1857 = vst.msk [vmem:[%s3431_s23 + $0xe8] sm:$0xff] %vm1827_vm2, %v1688_v61 }
 0x2eb   : > { %v2774_v62 = vpop.f32.mrb[64].mxu0 }
 0x2ec   : > { %v1709_v38 = vadd.f32 %v2774_v62, %v3427_v60  ;;  %v1700_v63 = vpop.f32.mrb[65].mxu0 }
 0x2ed   : > { %v1701_v0 = vadd.f32 %v1700_v63, %v3427_v60  ;;  %v2775_v1 = vpop.f32.mrb[66].mxu0 }
 0x2ee   : > { %1862 = vst.msk [vmem:[%s3431_s23 + $0x110] sm:$0xff] %vm1827_vm2, %v1709_v38  ;;  %v1712_v2 = vadd.f32 %v2775_v1, %v3427_v60  ;;  %v1703_v3 = vpop.f32.mrb[67].mxu0 }
 0x2ef   : > { %1860 = vst.msk [vmem:[%s3431_s23 + $0x100] sm:$0xff] %vm1827_vm2, %v1701_v0  ;;  %v1704_v4 = vadd.f32 %v1703_v3, %v3427_v60 }
 0x2f0   : > { %1863 = vst.msk [vmem:[%s3431_s23 + $0x118] sm:$0xff] %vm1827_vm2, %v1712_v2 }
 0x2f1   : > { %1861 = vst.msk [vmem:[%s3431_s23 + $0x108] sm:$0xff] %vm1827_vm2, %v1704_v4 }
 0x2f3   : > { %v2778_v5 = vpop.f32.mrb[68].mxu0 }
 0x2f4   : > { %v1725_v6 = vadd.f32 %v2778_v5, %v3427_v60  ;;  %v1716_v7 = vpop.f32.mrb[69].mxu0 }
 0x2f5   : > { %v1717_v8 = vadd.f32 %v1716_v7, %v3427_v60  ;;  %v2779_v9 = vpop.f32.mrb[70].mxu0 }
 0x2f6   : > { %1866 = vst.msk [vmem:[%s3431_s23 + $0x130] sm:$0xff] %vm1827_vm2, %v1725_v6  ;;  %v1728_v10 = vadd.f32 %v2779_v9, %v3427_v60  ;;  %v1719_v11 = vpop.f32.mrb[71].mxu0 }
 0x2f7   : > { %1864 = vst.msk [vmem:[%s3431_s23 + $0x120] sm:$0xff] %vm1827_vm2, %v1717_v8  ;;  %v1720_v13 = vadd.f32 %v1719_v11, %v3427_v60 }
 0x2f8   : > { %1867 = vst.msk [vmem:[%s3431_s23 + $0x138] sm:$0xff] %vm1827_vm2, %v1728_v10 }
 0x2f9   : > { %1865 = vst.msk [vmem:[%s3431_s23 + $0x128] sm:$0xff] %vm1827_vm2, %v1720_v13 }
 0x2fb   : > { %v2782_v14 = vpop.f32.mrb[72].mxu0 }
 0x2fc   : > { %v1741_v17 = vadd.f32 %v2782_v14, %v3427_v60  ;;  %v1732_v19 = vpop.f32.mrb[73].mxu0 }
 0x2fd   : > { %v1733_v20 = vadd.f32 %v1732_v19, %v3427_v60  ;;  %v2783_v21 = vpop.f32.mrb[74].mxu0 }
 0x2fe   : > { %1870 = vst.msk [vmem:[%s3431_s23 + $0x150] sm:$0xff] %vm1827_vm2, %v1741_v17  ;;  %v1744_v23 = vadd.f32 %v2783_v21, %v3427_v60  ;;  %v1735_v24 = vpop.f32.mrb[75].mxu0 }
 0x2ff   : > { %1868 = vst.msk [vmem:[%s3431_s23 + $0x140] sm:$0xff] %vm1827_vm2, %v1733_v20  ;;  %v1736_v26 = vadd.f32 %v1735_v24, %v3427_v60 }
 0x300   : > { %1871 = vst.msk [vmem:[%s3431_s23 + $0x158] sm:$0xff] %vm1827_vm2, %v1744_v23 }
 0x301   : > { %1869 = vst.msk [vmem:[%s3431_s23 + $0x148] sm:$0xff] %vm1827_vm2, %v1736_v26 }
 0x303   : > { %v2786_v27 = vpop.f32.mrb[76].mxu0 }
 0x304   : > { %v1757_v28 = vadd.f32 %v2786_v27, %v3427_v60  ;;  %v1748_v25 = vpop.f32.mrb[77].mxu0 }
 0x305   : > { %v1749_v22 = vadd.f32 %v1748_v25, %v3427_v60  ;;  %v2787_v51 = vpop.f32.mrb[78].mxu0 }
 0x306   : > { %1874 = vst.msk [vmem:[%s3431_s23 + $0x170] sm:$0xff] %vm1827_vm2, %v1757_v28  ;;  %v1760_v54 = vadd.f32 %v2787_v51, %v3427_v60  ;;  %v1751_v15 = vpop.f32.mrb[79].mxu0 }
 0x307   : > { %1872 = vst.msk [vmem:[%s3431_s23 + $0x160] sm:$0xff] %vm1827_vm2, %v1749_v22  ;;  %v1752_v18 = vadd.f32 %v1751_v15, %v3427_v60 }
 0x308   : > { %1875 = vst.msk [vmem:[%s3431_s23 + $0x178] sm:$0xff] %vm1827_vm2, %v1760_v54 }
 0x309   : > { %1873 = vst.msk [vmem:[%s3431_s23 + $0x168] sm:$0xff] %vm1827_vm2, %v1752_v18 }
 0x30b   : > { %v2790_v46 = vpop.f32.mrb[80].mxu0 }
 0x30c   : > { %v1773_v49 = vadd.f32 %v2790_v46, %v3427_v60  ;;  %v1764_v12 = vpop.f32.mrb[81].mxu0 }
 0x30d   : > { %v1765_v16 = vadd.f32 %v1764_v12, %v3427_v60  ;;  %v2791_v29 = vpop.f32.mrb[82].mxu0 }
 0x30e   : > { %1878 = vst.msk [vmem:[%s3431_s23 + $0x190] sm:$0xff] %vm1827_vm2, %v1773_v49  ;;  %v1776_v30 = vadd.f32 %v2791_v29, %v3427_v60  ;;  %v1767_v31 = vpop.f32.mrb[83].mxu0 }
 0x30f   : > { %1876 = vst.msk [vmem:[%s3431_s23 + $0x180] sm:$0xff] %vm1827_vm2, %v1765_v16  ;;  %v1768_v32 = vadd.f32 %v1767_v31, %v3427_v60 }
 0x310   : > { %1879 = vst.msk [vmem:[%s3431_s23 + $0x198] sm:$0xff] %vm1827_vm2, %v1776_v30 }
 0x311   : > { %1877 = vst.msk [vmem:[%s3431_s23 + $0x188] sm:$0xff] %vm1827_vm2, %v1768_v32 }
 0x313   : > { %v2794_v33 = vpop.f32.mrb[84].mxu0 }
 0x314   : > { %v1789_v34 = vadd.f32 %v2794_v33, %v3427_v60  ;;  %v1780_v35 = vpop.f32.mrb[85].mxu0 }
 0x315   : > { %v1781_v36 = vadd.f32 %v1780_v35, %v3427_v60  ;;  %v2795_v37 = vpop.f32.mrb[86].mxu0 }
 0x316   : > { %1882 = vst.msk [vmem:[%s3431_s23 + $0x1b0] sm:$0xff] %vm1827_vm2, %v1789_v34  ;;  %v1792_v39 = vadd.f32 %v2795_v37, %v3427_v60  ;;  %v1783_v40 = vpop.f32.mrb[87].mxu0 }
 0x317   : > { %1880 = vst.msk [vmem:[%s3431_s23 + $0x1a0] sm:$0xff] %vm1827_vm2, %v1781_v36  ;;  %v1784_v41 = vadd.f32 %v1783_v40, %v3427_v60 }
 0x318   : > { %1883 = vst.msk [vmem:[%s3431_s23 + $0x1b8] sm:$0xff] %vm1827_vm2, %v1792_v39 }
 0x319   : > { %1881 = vst.msk [vmem:[%s3431_s23 + $0x1a8] sm:$0xff] %vm1827_vm2, %v1784_v41 }
 0x31b   : > { %v2798_v42 = vpop.f32.mrb[88].mxu0 }
 0x31c   : > { %v1805_v43 = vadd.f32 %v2798_v42, %v3427_v60  ;;  %v1796_v44 = vpop.f32.mrb[89].mxu0 }
 0x31d   : > { %v1797_v45 = vadd.f32 %v1796_v44, %v3427_v60  ;;  %v2799_v47 = vpop.f32.mrb[90].mxu0 }
 0x31e   : > { %1886 = vst.msk [vmem:[%s3431_s23 + $0x1d0] sm:$0xff] %vm1827_vm2, %v1805_v43  ;;  %v1808_v48 = vadd.f32 %v2799_v47, %v3427_v60  ;;  %v1799_v50 = vpop.f32.mrb[91].mxu0 }
 0x31f   : > { %1884 = vst.msk [vmem:[%s3431_s23 + $0x1c0] sm:$0xff] %vm1827_vm2, %v1797_v45  ;;  %v1800_v52 = vadd.f32 %v1799_v50, %v3427_v60 }
 0x320   : > { %1887 = vst.msk [vmem:[%s3431_s23 + $0x1d8] sm:$0xff] %vm1827_vm2, %v1808_v48 }
 0x321   : > { %1885 = vst.msk [vmem:[%s3431_s23 + $0x1c8] sm:$0xff] %vm1827_vm2, %v1800_v52 }
 0x323   : > { %v2802_v53 = vpop.f32.mrb[92].mxu0  ;;  %1898 = sbr.rel (!%p3060_p4) target bundleno = 882 (0x372), region = 52 }
 0x324   : > { %v1821_v55 = vadd.f32 %v2802_v53, %v3427_v60  ;;  %v1812_v56 = vpop.f32.mrb[93].mxu0 }
 0x325   : > { %v1813_v57 = vadd.f32 %v1812_v56, %v3427_v60  ;;  %v2803_v58 = vpop.f32.mrb[94].mxu0 }
 0x326   : > { %1890 = vst.msk [vmem:[%s3431_s23 + $0x1f0] sm:$0xff] %vm1827_vm2, %v1821_v55  ;;  %v1824_v59 = vadd.f32 %v2803_v58, %v3427_v60  ;;  %v1815_v61 = vpop.f32.mrb[95].mxu0 }
 0x327   : > { %1888 = vst.msk [vmem:[%s3431_s23 + $0x1e0] sm:$0xff] %vm1827_vm2, %v1813_v57  ;;  %v1816_v62 = vadd.f32 %v1815_v61, %v3427_v60 }
 0x328   : > { %1891 = vst.msk [vmem:[%s3431_s23 + $0x1f8] sm:$0xff] %vm1827_vm2, %v1824_v59 }
 0x329   : > { %1889 = vst.msk [vmem:[%s3431_s23 + $0x1e8] sm:$0xff] %vm1827_vm2, %v1816_v62 }
 0x32a   : > { %s3847_s26 = smov (!%p1901_p8, %s1900_s26), 64 }
 0x32b   : > { %s2474_s8 = sshll.u32 %s3847_s26, 7 }
 0x32c   : > { %p2477_p9 = scmp.eq.s32.totalorder %s2474_s8, 0 }
 0x32d   : > { %s3636_s11 = sshrl.u32 (!%p2477_p9), %s3847_s26, 6 }
 0x32e   : > { %1909 = sbr.rel (%p2477_p9) target bundleno = 882 (0x372), region = 56  ;;  %p2478_p10 = scmp.le.s32.totalorder (!%p2477_p9), %s3636_s11, 0 }
 0x335   : > { %2315 = sbr.rel (%p2478_p10) target bundleno = 861 (0x35d), region = 132  ;;  %s3838_s6 = smov (!%p2478_p10), %s3630_s30 }
 0x336   : > { %s3839_s10 = smov (!%p2478_p10), %s3431_s23  ;;  %s3645_s13 = smov (!%p2478_p10), 0  }
 0x337   : > { %s3647_s12 = smov (!%p2478_p10), 0  }
 0x33c LB: >> { %v2097_v60 = vld [vmem:[%s2966_s10] sm:$0xff]  ;;  %v2099_v38 = vld [vmem:[%s2966_s10 + $0x8] sm:$0xff]  ;;  %v2101_v63 = vld [vmem:[%s2966_s10 + $0x10] sm:$0xff]  ;;  %s2225_s14 = sadd.s32 1, %s2970_s13  ;;  %s2091_s12 = sadd.s32 1, %s2974_s12   ;;  %s2974_s12 = sphi %s3647_s12, %s2091_s12   ;;  %s2970_s13 = sphi %s3645_s13, %s3842_s13   ;;  %s2966_s10 = sphi %s3839_s10, %s3841_s10   ;;  %s2962_s6 = sphi %s3838_s6, %s3840_s6  }
 0x33d   : >> { %2098 = vst [vmem:[%s2962_s6] sm:$0xff] %v2097_v60  ;;  %2100 = vst [vmem:[%s2962_s6 + $0x8] sm:$0xff] %v2099_v38  ;;  %v2103_v0 = vld [vmem:[%s2966_s10 + $0x18] sm:$0xff]  ;;  %v2105_v1 = vld [vmem:[%s2966_s10 + $0x20] sm:$0xff]  ;;  %p2226_p11 = scmp.ge.s32.totalorder %s2225_s14, %s3636_s11  ;;  %p2090_p12 = scmp.ge.s32.totalorder %s2091_s12, %s3636_s11 }
 0x33e   : >> { %2102 = vst [vmem:[%s2962_s6 + $0x10] sm:$0xff] %v2101_v63  ;;  %v2107_v2 = vld [vmem:[%s2966_s10 + $0x28] sm:$0xff]  ;;  %2104 = vst [vmem:[%s2962_s6 + $0x18] sm:$0xff] %v2103_v0  ;;  %v2109_v3 = vld [vmem:[%s2966_s10 + $0x30] sm:$0xff] }
 0x33f   : >> { %2106 = vst [vmem:[%s2962_s6 + $0x20] sm:$0xff] %v2105_v1  ;;  %2108 = vst [vmem:[%s2962_s6 + $0x28] sm:$0xff] %v2107_v2  ;;  %v2111_v4 = vld [vmem:[%s2966_s10 + $0x38] sm:$0xff]  ;;  %v2113_v5 = vld [vmem:[%s2966_s10 + $0x40] sm:$0xff]  ;;  %s3849_s14 = smov (%p2226_p11, %s2225_s14), 0 }
 0x340   : >> { %2110 = vst [vmem:[%s2962_s6 + $0x30] sm:$0xff] %v2109_v3  ;;  %2112 = vst [vmem:[%s2962_s6 + $0x38] sm:$0xff] %v2111_v4  ;;  %v2115_v6 = vld [vmem:[%s2966_s10 + $0x48] sm:$0xff]  ;;  %v2117_v7 = vld [vmem:[%s2966_s10 + $0x50] sm:$0xff]  ;;  %s2479_s15 = sshll.u32 %s3849_s14, 9  ;;  %s3842_s13 = smov %s3849_s14 }
 0x341   : >> { %2114 = vst [vmem:[%s2962_s6 + $0x40] sm:$0xff] %v2113_v5  ;;  %v2119_v8 = vld [vmem:[%s2966_s10 + $0x58] sm:$0xff]  ;;  %2116 = vst [vmem:[%s2962_s6 + $0x48] sm:$0xff] %v2115_v6  ;;  %v2121_v9 = vld [vmem:[%s2966_s10 + $0x60] sm:$0xff]  ;;  %s3703_s16 = scalar_lea.vmem %s3431_s23, %s2479_s15 [#allocation3]   ;;  %s3706_s17 = scalar_lea.vmem %s3630_s30, %s2479_s15  }
 0x342   : >> { %2118 = vst [vmem:[%s2962_s6 + $0x50] sm:$0xff] %v2117_v7  ;;  %2120 = vst [vmem:[%s2962_s6 + $0x58] sm:$0xff] %v2119_v8  ;;  %v2123_v10 = vld [vmem:[%s2966_s10 + $0x68] sm:$0xff]  ;;  %v2125_v11 = vld [vmem:[%s2966_s10 + $0x70] sm:$0xff] }
 0x343   : >> { %2122 = vst [vmem:[%s2962_s6 + $0x60] sm:$0xff] %v2121_v9  ;;  %2124 = vst [vmem:[%s2962_s6 + $0x68] sm:$0xff] %v2123_v10  ;;  %v2127_v13 = vld [vmem:[%s2966_s10 + $0x78] sm:$0xff]  ;;  %v2129_v14 = vld [vmem:[%s2966_s10 + $0x80] sm:$0xff] }
 0x344   : >> { %2126 = vst [vmem:[%s2962_s6 + $0x70] sm:$0xff] %v2125_v11  ;;  %v2131_v17 = vld [vmem:[%s2966_s10 + $0x88] sm:$0xff]  ;;  %2128 = vst [vmem:[%s2962_s6 + $0x78] sm:$0xff] %v2127_v13  ;;  %v2133_v19 = vld [vmem:[%s2966_s10 + $0x90] sm:$0xff] }
 0x345   : >> { %2130 = vst [vmem:[%s2962_s6 + $0x80] sm:$0xff] %v2129_v14  ;;  %2132 = vst [vmem:[%s2962_s6 + $0x88] sm:$0xff] %v2131_v17  ;;  %v2135_v20 = vld [vmem:[%s2966_s10 + $0x98] sm:$0xff]  ;;  %v2137_v21 = vld [vmem:[%s2966_s10 + $0xa0] sm:$0xff] }
 0x346   : >> { %2134 = vst [vmem:[%s2962_s6 + $0x90] sm:$0xff] %v2133_v19  ;;  %2136 = vst [vmem:[%s2962_s6 + $0x98] sm:$0xff] %v2135_v20  ;;  %v2139_v23 = vld [vmem:[%s2966_s10 + $0xa8] sm:$0xff]  ;;  %v2141_v24 = vld [vmem:[%s2966_s10 + $0xb0] sm:$0xff] }
 0x347   : >> { %2138 = vst [vmem:[%s2962_s6 + $0xa0] sm:$0xff] %v2137_v21  ;;  %v2143_v26 = vld [vmem:[%s2966_s10 + $0xb8] sm:$0xff]  ;;  %2140 = vst [vmem:[%s2962_s6 + $0xa8] sm:$0xff] %v2139_v23  ;;  %v2145_v27 = vld [vmem:[%s2966_s10 + $0xc0] sm:$0xff] }
 0x348   : >> { %2142 = vst [vmem:[%s2962_s6 + $0xb0] sm:$0xff] %v2141_v24  ;;  %2144 = vst [vmem:[%s2962_s6 + $0xb8] sm:$0xff] %v2143_v26  ;;  %v2147_v28 = vld [vmem:[%s2966_s10 + $0xc8] sm:$0xff]  ;;  %v2149_v25 = vld [vmem:[%s2966_s10 + $0xd0] sm:$0xff] }
 0x349   : >> { %2146 = vst [vmem:[%s2962_s6 + $0xc0] sm:$0xff] %v2145_v27  ;;  %2148 = vst [vmem:[%s2962_s6 + $0xc8] sm:$0xff] %v2147_v28  ;;  %v2151_v22 = vld [vmem:[%s2966_s10 + $0xd8] sm:$0xff]  ;;  %v2153_v51 = vld [vmem:[%s2966_s10 + $0xe0] sm:$0xff] }
 0x34a   : >> { %2150 = vst [vmem:[%s2962_s6 + $0xd0] sm:$0xff] %v2149_v25  ;;  %v2155_v54 = vld [vmem:[%s2966_s10 + $0xe8] sm:$0xff]  ;;  %2152 = vst [vmem:[%s2962_s6 + $0xd8] sm:$0xff] %v2151_v22  ;;  %v2157_v15 = vld [vmem:[%s2966_s10 + $0xf0] sm:$0xff] }
 0x34b   : >> { %2154 = vst [vmem:[%s2962_s6 + $0xe0] sm:$0xff] %v2153_v51  ;;  %2156 = vst [vmem:[%s2962_s6 + $0xe8] sm:$0xff] %v2155_v54  ;;  %v2159_v18 = vld [vmem:[%s2966_s10 + $0xf8] sm:$0xff]  ;;  %v2161_v46 = vld [vmem:[%s2966_s10 + $0x100] sm:$0xff] }
 0x34c   : >> { %2158 = vst [vmem:[%s2962_s6 + $0xf0] sm:$0xff] %v2157_v15  ;;  %2160 = vst [vmem:[%s2962_s6 + $0xf8] sm:$0xff] %v2159_v18  ;;  %v2163_v49 = vld [vmem:[%s2966_s10 + $0x108] sm:$0xff]  ;;  %v2165_v12 = vld [vmem:[%s2966_s10 + $0x110] sm:$0xff] }
 0x34d   : >> { %2162 = vst [vmem:[%s2962_s6 + $0x100] sm:$0xff] %v2161_v46  ;;  %v2167_v16 = vld [vmem:[%s2966_s10 + $0x118] sm:$0xff]  ;;  %2164 = vst [vmem:[%s2962_s6 + $0x108] sm:$0xff] %v2163_v49  ;;  %v2169_v29 = vld [vmem:[%s2966_s10 + $0x120] sm:$0xff] }
 0x34e   : >> { %2166 = vst [vmem:[%s2962_s6 + $0x110] sm:$0xff] %v2165_v12  ;;  %2168 = vst [vmem:[%s2962_s6 + $0x118] sm:$0xff] %v2167_v16  ;;  %v2171_v30 = vld [vmem:[%s2966_s10 + $0x128] sm:$0xff]  ;;  %v2173_v31 = vld [vmem:[%s2966_s10 + $0x130] sm:$0xff] }
 0x34f   : >> { %2170 = vst [vmem:[%s2962_s6 + $0x120] sm:$0xff] %v2169_v29  ;;  %2172 = vst [vmem:[%s2962_s6 + $0x128] sm:$0xff] %v2171_v30  ;;  %v2175_v32 = vld [vmem:[%s2966_s10 + $0x138] sm:$0xff]  ;;  %v2177_v33 = vld [vmem:[%s2966_s10 + $0x140] sm:$0xff] }
 0x350   : >> { %2174 = vst [vmem:[%s2962_s6 + $0x130] sm:$0xff] %v2173_v31  ;;  %v2179_v34 = vld [vmem:[%s2966_s10 + $0x148] sm:$0xff]  ;;  %2176 = vst [vmem:[%s2962_s6 + $0x138] sm:$0xff] %v2175_v32  ;;  %v2181_v35 = vld [vmem:[%s2966_s10 + $0x150] sm:$0xff] }
 0x351   : >> { %2178 = vst [vmem:[%s2962_s6 + $0x140] sm:$0xff] %v2177_v33  ;;  %2180 = vst [vmem:[%s2962_s6 + $0x148] sm:$0xff] %v2179_v34  ;;  %v2183_v36 = vld [vmem:[%s2966_s10 + $0x158] sm:$0xff]  ;;  %v2185_v37 = vld [vmem:[%s2966_s10 + $0x160] sm:$0xff] }
 0x352   : >> { %2182 = vst [vmem:[%s2962_s6 + $0x150] sm:$0xff] %v2181_v35  ;;  %2184 = vst [vmem:[%s2962_s6 + $0x158] sm:$0xff] %v2183_v36  ;;  %v2187_v39 = vld [vmem:[%s2966_s10 + $0x168] sm:$0xff]  ;;  %v2189_v40 = vld [vmem:[%s2966_s10 + $0x170] sm:$0xff] }
 0x353   : >> { %2186 = vst [vmem:[%s2962_s6 + $0x160] sm:$0xff] %v2185_v37  ;;  %v2191_v41 = vld [vmem:[%s2966_s10 + $0x178] sm:$0xff]  ;;  %2188 = vst [vmem:[%s2962_s6 + $0x168] sm:$0xff] %v2187_v39  ;;  %v2193_v42 = vld [vmem:[%s2966_s10 + $0x180] sm:$0xff] }
 0x354   : >> { %2190 = vst [vmem:[%s2962_s6 + $0x170] sm:$0xff] %v2189_v40  ;;  %2192 = vst [vmem:[%s2962_s6 + $0x178] sm:$0xff] %v2191_v41  ;;  %v2195_v43 = vld [vmem:[%s2966_s10 + $0x188] sm:$0xff]  ;;  %v2197_v44 = vld [vmem:[%s2966_s10 + $0x190] sm:$0xff] }
 0x355   : >> { %2194 = vst [vmem:[%s2962_s6 + $0x180] sm:$0xff] %v2193_v42  ;;  %2196 = vst [vmem:[%s2962_s6 + $0x188] sm:$0xff] %v2195_v43  ;;  %v2199_v45 = vld [vmem:[%s2966_s10 + $0x198] sm:$0xff]  ;;  %v2201_v47 = vld [vmem:[%s2966_s10 + $0x1a0] sm:$0xff] }
 0x356   : >> { %2198 = vst [vmem:[%s2962_s6 + $0x190] sm:$0xff] %v2197_v44  ;;  %v2203_v48 = vld [vmem:[%s2966_s10 + $0x1a8] sm:$0xff]  ;;  %2200 = vst [vmem:[%s2962_s6 + $0x198] sm:$0xff] %v2199_v45  ;;  %v2205_v50 = vld [vmem:[%s2966_s10 + $0x1b0] sm:$0xff]  ;;  %2093 = sbr.rel (!%p2090_p12) target bundleno = 828 (0x33c), region = 138 }
 0x357   : >> { %2202 = vst [vmem:[%s2962_s6 + $0x1a0] sm:$0xff] %v2201_v47  ;;  %2204 = vst [vmem:[%s2962_s6 + $0x1a8] sm:$0xff] %v2203_v48  ;;  %v2207_v52 = vld [vmem:[%s2966_s10 + $0x1b8] sm:$0xff]  ;;  %v2209_v53 = vld [vmem:[%s2966_s10 + $0x1c0] sm:$0xff] }
 0x358   : >> { %2206 = vst [vmem:[%s2962_s6 + $0x1b0] sm:$0xff] %v2205_v50  ;;  %2208 = vst [vmem:[%s2962_s6 + $0x1b8] sm:$0xff] %v2207_v52  ;;  %v2211_v55 = vld [vmem:[%s2966_s10 + $0x1c8] sm:$0xff]  ;;  %v2213_v56 = vld [vmem:[%s2966_s10 + $0x1d0] sm:$0xff] }
 0x359   : >> { %2210 = vst [vmem:[%s2962_s6 + $0x1c0] sm:$0xff] %v2209_v53  ;;  %v2215_v57 = vld [vmem:[%s2966_s10 + $0x1d8] sm:$0xff]  ;;  %2212 = vst [vmem:[%s2962_s6 + $0x1c8] sm:$0xff] %v2211_v55  ;;  %v2217_v58 = vld [vmem:[%s2966_s10 + $0x1e0] sm:$0xff] }
 0x35a   : >> { %2214 = vst [vmem:[%s2962_s6 + $0x1d0] sm:$0xff] %v2213_v56  ;;  %2216 = vst [vmem:[%s2962_s6 + $0x1d8] sm:$0xff] %v2215_v57  ;;  %v2219_v59 = vld [vmem:[%s2966_s10 + $0x1e8] sm:$0xff]  ;;  %v2221_v61 = vld [vmem:[%s2966_s10 + $0x1f0] sm:$0xff] }
 0x35b   : >> { %2218 = vst [vmem:[%s2962_s6 + $0x1e0] sm:$0xff] %v2217_v58  ;;  %2220 = vst [vmem:[%s2962_s6 + $0x1e8] sm:$0xff] %v2219_v59  ;;  %v2223_v62 = vld [vmem:[%s2966_s10 + $0x1f8] sm:$0xff]  ;;  %s3841_s10 = smov %s3703_s16 }
 0x35c   : >> { %2222 = vst [vmem:[%s2962_s6 + $0x1f0] sm:$0xff] %v2221_v61  ;;  %2224 = vst [vmem:[%s2962_s6 + $0x1f8] sm:$0xff] %v2223_v62  ;;  %s3840_s6 = smov %s3706_s17 }
 0x35d PF: > { %s3811_s18 = sand.u32 63, %s3847_s26   ;;  %s2490_s19 = sshll.u32 %s3636_s11, 9 }
 0x35e   : > { %s2236_s20 = scalar_lea.vmem %s3431_s23, %s2490_s19 [#allocation3]   ;;  %s2238_s21 = scalar_lea.vmem %s3630_s30, %s2490_s19  }
 0x35f   : > { %p2484_p13 = scmp.le.s32.totalorder %s3811_s18, 0 }
 0x360   : > { %s2976_s22 = smov (!%p2484_p13), %s2238_s21   ;;  %s2980_s24 = smov (!%p2484_p13), %s2236_s20  }
 0x361   : > { %2329 = sbr.rel (%p2484_p13) target bundleno = 882 (0x372), region = 143  ;;  %s2984_s25 = smov (!%p2484_p13), 0  }
 0x362   : > { %s2988_s28 = smov (!%p2484_p13), 0  }
 0x368 LB: >> { %v2248_v60 = vld [vmem:[%s2982_s24] sm:$0xff]  ;;  %s2250_s26 = sadd.s32 1, %s2986_s25  ;;  %s2242_s28 = sadd.s32 1, %s2990_s28   ;;  %s2990_s28 = sphi %s2988_s28, %s2242_s28   ;;  %s2986_s25 = sphi %s2984_s25, %s2985_s25   ;;  %s2982_s24 = sphi %s2980_s24, %s2255_s24   ;;  %s2978_s22 = sphi %s2976_s22, %s2256_s22  }
 0x369   : >> { %2249 = vst [vmem:[%s2978_s22] sm:$0xff] %v2248_v60  ;;  %p2251_p0 = scmp.ge.s32.totalorder %s2250_s26, %s3811_s18  ;;  %p2241_p1 = scmp.ge.s32.totalorder %s2242_s28, %s3811_s18 }
 0x36b   : >> { %s3851_s26 = smov (%p2251_p0, %s2250_s26), 0  ;;  %2244 = sbr.rel (!%p2241_p1) target bundleno = 872 (0x368), region = 149 }
 0x36c   : >> { %s2485_s23 = sshll.u32 %s3851_s26, 3  ;;  %s2985_s25 = smov %s3851_s26  }
 0x36d   : >> { %s2255_s24 = scalar_lea.vmem %s2236_s20, %s2485_s23 [#allocation3]   ;;  %s2256_s22 = scalar_lea.vmem %s2238_s21, %s2485_s23  }
 0x372 PF: > { %p15_p2 = scmp.ge.s32.totalorder %s3050_s29, 4   ;;  %s3843_s26 = smov %s2954_s27 }
 0x373   : > { %s3844_s27 = smov %s3058_s9  ;;  %s3845_s28 = smov %s3050_s29 }
 0x374   :  { %17 = sbr.rel (!%p15_p2) target bundleno = 4 (0x4), region = 160 }

</bundles_post_ra>
